<compile_context>
chip_gen: v6e
topology: v6e:2x2x1
jax: 0.10.0
libtpu: 0.0.40
codegen_flags: <defaults>
</compile_context>

<pallas_src>
import functools

import numpy as np
import jax
import jax.numpy as jnp
from jax.experimental import pallas as pl
from jax.experimental.pallas import tpu as pltpu


def _round_up(x, m):
    return (x + m - 1) // m * m


# ----------------------------- Pallas kernel ------------------------------

def _text_fe_kernel(*refs, T, Bp, H, num_layers):
    """Fused img_linear + multi-layer LSTM forward (single invocation, no grid).

    refs = (x, img_feat, w_img, b_img, [w_ih, w_hh, b] * num_layers, out, seq_scr)

      x        [T*Bp, E_pad]  bf16  time-major embedded tokens
      img_feat [Bp, F_pad]    bf16  image features, repeated per caption
      w_img    [F_pad, H]     bf16  img_linear weight (pre-transposed)
      b_img    [1, H]         f32
      w_ih_l   [E_l, 4H]      bf16  input projection (pre-transposed, zero-padded)
      w_hh_l   [H, 4H]        bf16  recurrent projection (pre-transposed)
      b_l      [1, 4H]        f32   b_ih + b_hh (fused once)
      out      [Bp, T*H]      f32   h_t stored at lanes [t*H:(t+1)*H]  (lane-dense)
      seq_scr  [T*Bp, H]      bf16  VMEM scratch: layer output -> next layer input
    """
    x_ref, imgf_ref, w_img_ref, b_img_ref = refs[:4]
    layer_refs = refs[4:4 + 3 * num_layers]
    out_ref = refs[4 + 3 * num_layers]
    seq_scr = refs[5 + 3 * num_layers]

    # img_linear: the SAME h0 is fed to every LSTM layer, c0 = 0 (matches PyTorch
    # h_0 = img_features.unsqueeze(0).repeat(num_layers, 1, 1), c_0 = zeros).
    h0 = (jnp.dot(imgf_ref[...], w_img_ref[...],
                  preferred_element_type=jnp.float32) + b_img_ref[...])        # [Bp, H]

    # Lane mask of the tanh ("g") gate inside the [Bp, 4H] gate block (hoisted out
    # of all loops; torch.nn.LSTM gate order is i, f, g, o).
    lane = jax.lax.broadcasted_iota(jnp.int32, (Bp, 4 * H), dimension=1)
    is_g_gate = (lane >= 2 * H) & (lane < 3 * H)

    seq = x_ref[...]                                                           # [T*Bp, E]
    for layer in range(num_layers):
        w_ih = layer_refs[3 * layer][...]
        w_hh = layer_refs[3 * layer + 1][...]
        b = layer_refs[3 * layer + 2][...]

        # Hoisted input projection: one MXU matmul covering all T timesteps.
        gates_x = jnp.dot(seq, w_ih, preferred_element_type=jnp.float32) + b   # [T*Bp, 4H]

        h = h0
        c = jnp.zeros_like(h0)
        last = layer == num_layers - 1
        for t in range(T):   # fully unrolled at trace time; only h @ W_hh is serial
            pre = gates_x[t * Bp:(t + 1) * Bp, :] + jnp.dot(
                h.astype(jnp.bfloat16), w_hh, preferred_element_type=jnp.float32)
            # Single full-width logistic pass over the lane-dense [Bp, 4H] block:
            # sigmoid for i/f/o lanes, tanh for g lanes via tanh(x) = 2*sigmoid(2x) - 1.
            z = jnp.where(is_g_gate, pre + pre, pre)
            s = jax.nn.sigmoid(z)
            act = jnp.where(is_g_gate, s + s - 1.0, s)
            i_g = act[:, 0:H]
            f_g = act[:, H:2 * H]
            g_g = act[:, 2 * H:3 * H]
            o_g = act[:, 3 * H:4 * H]
            c = f_g * c + i_g * g_g
            h = o_g * jnp.tanh(c)
            if last:
                out_ref[:, t * H:(t + 1) * H] = h
            else:
                seq_scr[t * Bp:(t + 1) * Bp, :] = h.astype(jnp.bfloat16)
        if not last:
            seq = seq_scr[...]        # already bf16: feeds next layer's MXU matmul
        # TODO(synk): nn.LSTM inter-layer dropout(0.5) treated as eval-mode identity.


# ----------------------------- forward wrapper ------------------------------

@jax.jit
def text_fe_forward(kp, texts, img_features):
    """texts [B, NC, T] int32, img_features [B, F] f32  ->  lstm_out [B, NC, T, H]."""
    B, NC, T = texts.shape
    Bp = B * NC
    Bp_pad = _round_up(Bp, 8)                       # sublane multiple
    E_pad = kp['embed'].shape[1]
    F_pad, H = kp['w_img'].shape
    num_layers = len(kp['lstm'])

    # nn.Embedding gather stays in XLA (data-dependent row gather on a tiny table);
    # laid out time-major so the kernel's hoisted matmul sees one [T*Bp, E] operand.
    tok = texts.reshape(Bp, T)
    emb = jnp.take(kp['embed'], tok, axis=0)        # [Bp, T, E_pad] bf16
    emb = jnp.transpose(emb, (1, 0, 2))             # [T, Bp, E_pad]
    emb = jnp.pad(emb, ((0, 0), (0, Bp_pad - Bp), (0, 0)))
    x = emb.reshape(T * Bp_pad, E_pad)

    # repeat image features per caption (row order b0c0, b0c1, ... matches texts.reshape)
    imgf = jnp.repeat(img_features.astype(jnp.bfloat16), NC, axis=0)
    imgf = jnp.pad(imgf, ((0, Bp_pad - Bp), (0, F_pad - img_features.shape[1])))

    layer_args = []
    for lp in kp['lstm']:
        layer_args += [lp['w_ih'], lp['w_hh'], lp['b']]
    n_in = 4 + 3 * num_layers

    kernel = functools.partial(_text_fe_kernel, T=T, Bp=Bp_pad, H=H,
                               num_layers=num_layers)
    out = pl.pallas_call(
        kernel,
        out_shape=jax.ShapeDtypeStruct((Bp_pad, T * H), jnp.float32),
        # Single ungridded invocation: all operands (~0.2 MiB total) are whole-array
        # resident in VMEM; no vmem_limit override needed on any TPU generation.
        in_specs=[pl.BlockSpec(memory_space=pltpu.MemorySpace.VMEM)] * n_in,
        out_specs=pl.BlockSpec(memory_space=pltpu.MemorySpace.VMEM),
        scratch_shapes=[pltpu.VMEM((T * Bp_pad, H), jnp.bfloat16)],
    )(x, imgf, kp['w_img'], kp['b_img'], *layer_args)

    return out[:Bp].reshape(Bp, T, H).reshape(B, NC, T, H)


# ----------------------------- parameters ------------------------------

class _KeyGen:
    def __init__(self, key):
        self._key = key

    def __call__(self):
        self._key, sub = jax.random.split(self._key)
        return sub


def make_raw_params(key, vocab_size, emb_size, hidden_size, num_layers, img_feature_size):
    """PyTorch-layout parameters (nn.LSTM / nn.Linear style uniform init)."""
    kg = _KeyGen(key)
    embed = 0.1 * jax.random.normal(kg(), (vocab_size, emb_size), jnp.float32)
    embed = embed.at[3].set(0.0)                 # nn.Embedding(padding_idx=3)
    # TODO(synk): glove_weights are accepted by the PyTorch ctor but never applied
    # in the shown module; embedding stays randomly initialised here as well.

    def _uniform(k, shape, bound):
        return jax.random.uniform(k, shape, jnp.float32, -bound, bound)

    lstm = []
    bound = 1.0 / np.sqrt(hidden_size)
    for layer in range(num_layers):
        in_size = emb_size if layer == 0 else hidden_size
        lstm.append({
            'w_ih': _uniform(kg(), (4 * hidden_size, in_size), bound),
            'w_hh': _uniform(kg(), (4 * hidden_size, hidden_size), bound),
            'b_ih': _uniform(kg(), (4 * hidden_size,), bound),
            'b_hh': _uniform(kg(), (4 * hidden_size,), bound),
        })
    lb = 1.0 / np.sqrt(img_feature_size)
    return {
        'embed': embed,
        'img_linear_w': _uniform(kg(), (hidden_size, img_feature_size), lb),
        'img_linear_b': _uniform(kg(), (hidden_size,), lb),
        'lstm': lstm,
    }


def prepare_params(raw):
    """One-time kernel-layout prep: transpose, zero-pad to lane multiples, cast to bf16,
    fuse the two LSTM bias vectors.  (With H=32, 4H=128 the gate block is one vreg.)"""
    _, E = raw['embed'].shape
    H, F = raw['img_linear_w'].shape
    E_pad = _round_up(E, 128)
    F_pad = _round_up(F, 128)
    embed = jnp.pad(raw['embed'], ((0, 0), (0, E_pad - E))).astype(jnp.bfloat16)
    w_img = jnp.pad(raw['img_linear_w'].T, ((0, F_pad - F), (0, 0))).astype(jnp.bfloat16)
    b_img = raw['img_linear_b'].reshape(1, H).astype(jnp.float32)
    lstm = []
    for li, lp in enumerate(raw['lstm']):
        in_size = lp['w_ih'].shape[1]
        in_pad = E_pad if li == 0 else in_size
        w_ih = jnp.pad(lp['w_ih'].T, ((0, in_pad - in_size), (0, 0))).astype(jnp.bfloat16)
        w_hh = lp['w_hh'].T.astype(jnp.bfloat16)
        b = (lp['b_ih'] + lp['b_hh']).reshape(1, -1).astype(jnp.float32)
        lstm.append({'w_ih': w_ih, 'w_hh': w_hh, 'b': b})
    return {'embed': embed, 'w_img': w_img, 'b_img': b_img, 'lstm': lstm}


# ----------------------------- pure-JAX reference ------------------------------

def text_fe_reference(raw, texts, img_features):
    """f32 reference mirroring the PyTorch forward (for correctness checking)."""
    B, NC, T = texts.shape
    H = raw['img_linear_w'].shape[0]
    tok = texts.reshape(-1, T)
    x = raw['embed'][tok]                                              # [Bp, T, E]
    img_h = img_features @ raw['img_linear_w'].T + raw['img_linear_b']
    h0 = jnp.repeat(img_h, NC, axis=0)                                 # [Bp, H]
    for lp in raw['lstm']:
        h, c = h0, jnp.zeros_like(h0)
        outs = []
        for t in range(T):
            g = x[:, t, :] @ lp['w_ih'].T + h @ lp['w_hh'].T + lp['b_ih'] + lp['b_hh']
            i = jax.nn.sigmoid(g[:, :H])
            f = jax.nn.sigmoid(g[:, H:2 * H])
            gg = jnp.tanh(g[:, 2 * H:3 * H])
            o = jax.nn.sigmoid(g[:, 3 * H:])
            c = f * c + i * gg
            h = o * jnp.tanh(c)
            outs.append(h)
        x = jnp.stack(outs, axis=1)                                    # [Bp, T, H]
    return x.reshape(B, NC, T, H)


# ----------------------------- main ------------------------------

if __name__ == "__main__":
    VOCAB, EMB, HIDDEN, NUM_LAYERS = 50, 300, 32, 2
    NUM_CAPTIONS, SEQ, IMG_FEAT = 3, 8, 256
    B = 2

    key = jax.random.PRNGKey(0)
    k_params, k_txt, k_img = jax.random.split(key, 3)

    raw = make_raw_params(k_params, VOCAB, EMB, HIDDEN, NUM_LAYERS, IMG_FEAT)
    kparams = prepare_params(raw)

    texts = jax.random.randint(k_txt, (B, NUM_CAPTIONS, SEQ), 0, VOCAB, dtype=jnp.int32)
    img_features = jax.random.normal(k_img, (B, IMG_FEAT), dtype=jnp.float32)

    out = text_fe_forward(kparams, texts, img_features)
    out = jax.block_until_ready(out)

    assert out.shape == (B, NUM_CAPTIONS, SEQ, HIDDEN), out.shape
    assert bool(jnp.all(jnp.isfinite(out)))

    ref = text_fe_reference(raw, texts, img_features)
    max_err = float(jnp.max(jnp.abs(out - ref)))
    assert max_err < 5e-2, f"max abs error vs reference: {max_err}"  # bf16 MXU operands

    print("KERNEL_OK")
</pallas_src>

<mosaic_0001>
module attributes {stable_mosaic.version = 11 : i64} {
  func.func @_text_fe_kernel(%arg0: memref<64x384xbf16, #tpu.memory_space<vmem>>, %arg1: memref<8x256xbf16, #tpu.memory_space<vmem>>, %arg2: memref<256x32xbf16, #tpu.memory_space<vmem>>, %arg3: memref<1x32xf32, #tpu.memory_space<vmem>>, %arg4: memref<384x128xbf16, #tpu.memory_space<vmem>>, %arg5: memref<32x128xbf16, #tpu.memory_space<vmem>>, %arg6: memref<1x128xf32, #tpu.memory_space<vmem>>, %arg7: memref<32x128xbf16, #tpu.memory_space<vmem>>, %arg8: memref<32x128xbf16, #tpu.memory_space<vmem>>, %arg9: memref<1x128xf32, #tpu.memory_space<vmem>>, %arg10: memref<8x256xf32, #tpu.memory_space<vmem>>, %arg11: memref<64x32xbf16, #tpu.memory_space<vmem>>) attributes {dimension_semantics = [], scalar_prefetch = 0 : i64, scratch_operands = 1 : i64, tpu.core_type = #tpu.core_type<tc>} {
    %c0 = arith.constant 0 : index
    %c0_0 = arith.constant 0 : index
    %0 = vector.load %arg1[%c0, %c0_0] : memref<8x256xbf16, #tpu.memory_space<vmem>>, vector<8x256xbf16>
    %c0_1 = arith.constant 0 : index
    %c0_2 = arith.constant 0 : index
    %1 = vector.load %arg2[%c0_1, %c0_2] : memref<256x32xbf16, #tpu.memory_space<vmem>>, vector<256x32xbf16>
    %cst = arith.constant dense<0.000000e+00> : vector<8x32xf32>
    %2 = tpu.matmul %0, %1, %cst {dimension_numbers = #tpu.dot_dimension_numbers<[1], [0], [0], [1], [0, 0, 1, 1], [], []>} : vector<8x256xbf16>, vector<256x32xbf16>, vector<8x32xf32> -> vector<8x32xf32>
    %c0_3 = arith.constant 0 : index
    %c0_4 = arith.constant 0 : index
    %3 = vector.load %arg3[%c0_3, %c0_4] : memref<1x32xf32, #tpu.memory_space<vmem>>, vector<1x32xf32>
    %4 = vector.broadcast %3 : vector<1x32xf32> to vector<8x32xf32>
    %5 = arith.addf %2, %4 : vector<8x32xf32>
    %6 = tpu.iota {dimensions = array<i32: 1>} : vector<8x128xi32>
    %c64_i32 = arith.constant 64 : i32
    %7 = vector.broadcast %c64_i32 : i32 to vector<8x128xi32>
    %8 = arith.cmpi sge, %6, %7 : vector<8x128xi32>
    %c96_i32 = arith.constant 96 : i32
    %9 = vector.broadcast %c96_i32 : i32 to vector<8x128xi32>
    %10 = arith.cmpi slt, %6, %9 : vector<8x128xi32>
    %11 = arith.andi %8, %10 : vector<8x128xi1>
    %c0_5 = arith.constant 0 : index
    %c0_6 = arith.constant 0 : index
    %12 = vector.load %arg0[%c0_5, %c0_6] : memref<64x384xbf16, #tpu.memory_space<vmem>>, vector<64x384xbf16>
    %c0_7 = arith.constant 0 : index
    %c0_8 = arith.constant 0 : index
    %13 = vector.load %arg4[%c0_7, %c0_8] : memref<384x128xbf16, #tpu.memory_space<vmem>>, vector<384x128xbf16>
    %c0_9 = arith.constant 0 : index
    %c0_10 = arith.constant 0 : index
    %14 = vector.load %arg5[%c0_9, %c0_10] : memref<32x128xbf16, #tpu.memory_space<vmem>>, vector<32x128xbf16>
    %c0_11 = arith.constant 0 : index
    %c0_12 = arith.constant 0 : index
    %15 = vector.load %arg6[%c0_11, %c0_12] : memref<1x128xf32, #tpu.memory_space<vmem>>, vector<1x128xf32>
    %cst_13 = arith.constant dense<0.000000e+00> : vector<64x128xf32>
    %16 = tpu.matmul %12, %13, %cst_13 {dimension_numbers = #tpu.dot_dimension_numbers<[1], [0], [0], [1], [0, 0, 1, 1], [], []>} : vector<64x384xbf16>, vector<384x128xbf16>, vector<64x128xf32> -> vector<64x128xf32>
    %17 = vector.broadcast %15 : vector<1x128xf32> to vector<64x128xf32>
    %18 = arith.addf %16, %17 : vector<64x128xf32>
    %cst_14 = arith.constant 0.000000e+00 : f32
    %19 = vector.broadcast %cst_14 : f32 to vector<8x32xf32>
    %20 = vector.extract_strided_slice %18 {offsets = [0, 0], sizes = [8, 128], strides = [1, 1]} : vector<64x128xf32> to vector<8x128xf32>
    %21 = arith.truncf %5 : vector<8x32xf32> to vector<8x32xbf16>
    %cst_15 = arith.constant dense<0.000000e+00> : vector<8x128xf32>
    %22 = tpu.matmul %21, %14, %cst_15 {dimension_numbers = #tpu.dot_dimension_numbers<[1], [0], [0], [1], [0, 0, 1, 1], [], []>} : vector<8x32xbf16>, vector<32x128xbf16>, vector<8x128xf32> -> vector<8x128xf32>
    %23 = arith.addf %20, %22 : vector<8x128xf32>
    %24 = arith.addf %23, %23 : vector<8x128xf32>
    %25 = arith.select %11, %24, %23 : vector<8x128xi1>, vector<8x128xf32>
    %26 = arith.negf %25 : vector<8x128xf32>
    %27 = math.exp %26 : vector<8x128xf32>
    %cst_16 = arith.constant 1.000000e+00 : f32
    %28 = vector.broadcast %cst_16 : f32 to vector<8x128xf32>
    %29 = arith.addf %28, %27 : vector<8x128xf32>
    %30 = arith.divf %28, %29 : vector<8x128xf32>
    %31 = arith.addf %30, %30 : vector<8x128xf32>
    %cst_17 = arith.constant 1.000000e+00 : f32
    %32 = vector.broadcast %cst_17 : f32 to vector<8x128xf32>
    %33 = arith.subf %31, %32 : vector<8x128xf32>
    %34 = arith.select %11, %33, %30 : vector<8x128xi1>, vector<8x128xf32>
    %35 = vector.extract_strided_slice %34 {offsets = [0, 0], sizes = [8, 32], strides = [1, 1]} : vector<8x128xf32> to vector<8x32xf32>
    %36 = vector.extract_strided_slice %34 {offsets = [0, 32], sizes = [8, 32], strides = [1, 1]} : vector<8x128xf32> to vector<8x32xf32>
    %37 = vector.extract_strided_slice %34 {offsets = [0, 64], sizes = [8, 32], strides = [1, 1]} : vector<8x128xf32> to vector<8x32xf32>
    %38 = vector.extract_strided_slice %34 {offsets = [0, 96], sizes = [8, 32], strides = [1, 1]} : vector<8x128xf32> to vector<8x32xf32>
    %39 = arith.mulf %36, %19 : vector<8x32xf32>
    %40 = arith.mulf %35, %37 : vector<8x32xf32>
    %41 = arith.addf %39, %40 : vector<8x32xf32>
    %42 = math.tanh %41 : vector<8x32xf32>
    %43 = arith.mulf %38, %42 : vector<8x32xf32>
    %44 = arith.truncf %43 : vector<8x32xf32> to vector<8x32xbf16>
    %c0_18 = arith.constant 0 : index
    %c0_19 = arith.constant 0 : index
    %45 = vector.load %arg11[%c0_18, %c0_19] : memref<64x32xbf16, #tpu.memory_space<vmem>>, vector<8x32xbf16>
    tpu.vector_store %arg11[%c0_18, %c0_19], %44 {strides = array<i32>} : memref<64x32xbf16, #tpu.memory_space<vmem>>, vector<8x32xbf16>,
    %46 = vector.extract_strided_slice %18 {offsets = [8, 0], sizes = [8, 128], strides = [1, 1]} : vector<64x128xf32> to vector<8x128xf32>
    %47 = arith.truncf %43 : vector<8x32xf32> to vector<8x32xbf16>
    %cst_20 = arith.constant dense<0.000000e+00> : vector<8x128xf32>
    %48 = tpu.matmul %47, %14, %cst_20 {dimension_numbers = #tpu.dot_dimension_numbers<[1], [0], [0], [1], [0, 0, 1, 1], [], []>} : vector<8x32xbf16>, vector<32x128xbf16>, vector<8x128xf32> -> vector<8x128xf32>
    %49 = arith.addf %46, %48 : vector<8x128xf32>
    %50 = arith.addf %49, %49 : vector<8x128xf32>
    %51 = arith.select %11, %50, %49 : vector<8x128xi1>, vector<8x128xf32>
    %52 = arith.negf %51 : vector<8x128xf32>
    %53 = math.exp %52 : vector<8x128xf32>
    %cst_21 = arith.constant 1.000000e+00 : f32
    %54 = vector.broadcast %cst_21 : f32 to vector<8x128xf32>
    %55 = arith.addf %54, %53 : vector<8x128xf32>
    %56 = arith.divf %54, %55 : vector<8x128xf32>
    %57 = arith.addf %56, %56 : vector<8x128xf32>
    %cst_22 = arith.constant 1.000000e+00 : f32
    %58 = vector.broadcast %cst_22 : f32 to vector<8x128xf32>
    %59 = arith.subf %57, %58 : vector<8x128xf32>
    %60 = arith.select %11, %59, %56 : vector<8x128xi1>, vector<8x128xf32>
    %61 = vector.extract_strided_slice %60 {offsets = [0, 0], sizes = [8, 32], strides = [1, 1]} : vector<8x128xf32> to vector<8x32xf32>
    %62 = vector.extract_strided_slice %60 {offsets = [0, 32], sizes = [8, 32], strides = [1, 1]} : vector<8x128xf32> to vector<8x32xf32>
    %63 = vector.extract_strided_slice %60 {offsets = [0, 64], sizes = [8, 32], strides = [1, 1]} : vector<8x128xf32> to vector<8x32xf32>
    %64 = vector.extract_strided_slice %60 {offsets = [0, 96], sizes = [8, 32], strides = [1, 1]} : vector<8x128xf32> to vector<8x32xf32>
    %65 = arith.mulf %62, %41 : vector<8x32xf32>
    %66 = arith.mulf %61, %63 : vector<8x32xf32>
    %67 = arith.addf %65, %66 : vector<8x32xf32>
    %68 = math.tanh %67 : vector<8x32xf32>
    %69 = arith.mulf %64, %68 : vector<8x32xf32>
    %70 = arith.truncf %69 : vector<8x32xf32> to vector<8x32xbf16>
    %c8 = arith.constant 8 : index
    %c0_23 = arith.constant 0 : index
    %71 = vector.load %arg11[%c8, %c0_23] : memref<64x32xbf16, #tpu.memory_space<vmem>>, vector<8x32xbf16>
    tpu.vector_store %arg11[%c8, %c0_23], %70 {strides = array<i32>} : memref<64x32xbf16, #tpu.memory_space<vmem>>, vector<8x32xbf16>,
    %72 = vector.extract_strided_slice %18 {offsets = [16, 0], sizes = [8, 128], strides = [1, 1]} : vector<64x128xf32> to vector<8x128xf32>
    %73 = arith.truncf %69 : vector<8x32xf32> to vector<8x32xbf16>
    %cst_24 = arith.constant dense<0.000000e+00> : vector<8x128xf32>
    %74 = tpu.matmul %73, %14, %cst_24 {dimension_numbers = #tpu.dot_dimension_numbers<[1], [0], [0], [1], [0, 0, 1, 1], [], []>} : vector<8x32xbf16>, vector<32x128xbf16>, vector<8x128xf32> -> vector<8x128xf32>
    %75 = arith.addf %72, %74 : vector<8x128xf32>
    %76 = arith.addf %75, %75 : vector<8x128xf32>
    %77 = arith.select %11, %76, %75 : vector<8x128xi1>, vector<8x128xf32>
    %78 = arith.negf %77 : vector<8x128xf32>
    %79 = math.exp %78 : vector<8x128xf32>
    %cst_25 = arith.constant 1.000000e+00 : f32
    %80 = vector.broadcast %cst_25 : f32 to vector<8x128xf32>
    %81 = arith.addf %80, %79 : vector<8x128xf32>
    %82 = arith.divf %80, %81 : vector<8x128xf32>
    %83 = arith.addf %82, %82 : vector<8x128xf32>
    %cst_26 = arith.constant 1.000000e+00 : f32
    %84 = vector.broadcast %cst_26 : f32 to vector<8x128xf32>
    %85 = arith.subf %83, %84 : vector<8x128xf32>
    %86 = arith.select %11, %85, %82 : vector<8x128xi1>, vector<8x128xf32>
    %87 = vector.extract_strided_slice %86 {offsets = [0, 0], sizes = [8, 32], strides = [1, 1]} : vector<8x128xf32> to vector<8x32xf32>
    %88 = vector.extract_strided_slice %86 {offsets = [0, 32], sizes = [8, 32], strides = [1, 1]} : vector<8x128xf32> to vector<8x32xf32>
    %89 = vector.extract_strided_slice %86 {offsets = [0, 64], sizes = [8, 32], strides = [1, 1]} : vector<8x128xf32> to vector<8x32xf32>
    %90 = vector.extract_strided_slice %86 {offsets = [0, 96], sizes = [8, 32], strides = [1, 1]} : vector<8x128xf32> to vector<8x32xf32>
    %91 = arith.mulf %88, %67 : vector<8x32xf32>
    %92 = arith.mulf %87, %89 : vector<8x32xf32>
    %93 = arith.addf %91, %92 : vector<8x32xf32>
    %94 = math.tanh %93 : vector<8x32xf32>
    %95 = arith.mulf %90, %94 : vector<8x32xf32>
    %96 = arith.truncf %95 : vector<8x32xf32> to vector<8x32xbf16>
    %c16 = arith.constant 16 : index
    %c0_27 = arith.constant 0 : index
    %97 = vector.load %arg11[%c16, %c0_27] : memref<64x32xbf16, #tpu.memory_space<vmem>>, vector<8x32xbf16>
    tpu.vector_store %arg11[%c16, %c0_27], %96 {strides = array<i32>} : memref<64x32xbf16, #tpu.memory_space<vmem>>, vector<8x32xbf16>,
    %98 = vector.extract_strided_slice %18 {offsets = [24, 0], sizes = [8, 128], strides = [1, 1]} : vector<64x128xf32> to vector<8x128xf32>
    %99 = arith.truncf %95 : vector<8x32xf32> to vector<8x32xbf16>
    %cst_28 = arith.constant dense<0.000000e+00> : vector<8x128xf32>
    %100 = tpu.matmul %99, %14, %cst_28 {dimension_numbers = #tpu.dot_dimension_numbers<[1], [0], [0], [1], [0, 0, 1, 1], [], []>} : vector<8x32xbf16>, vector<32x128xbf16>, vector<8x128xf32> -> vector<8x128xf32>
    %101 = arith.addf %98, %100 : vector<8x128xf32>
    %102 = arith.addf %101, %101 : vector<8x128xf32>
    %103 = arith.select %11, %102, %101 : vector<8x128xi1>, vector<8x128xf32>
    %104 = arith.negf %103 : vector<8x128xf32>
    %105 = math.exp %104 : vector<8x128xf32>
    %cst_29 = arith.constant 1.000000e+00 : f32
    %106 = vector.broadcast %cst_29 : f32 to vector<8x128xf32>
    %107 = arith.addf %106, %105 : vector<8x128xf32>
    %108 = arith.divf %106, %107 : vector<8x128xf32>
    %109 = arith.addf %108, %108 : vector<8x128xf32>
    %cst_30 = arith.constant 1.000000e+00 : f32
    %110 = vector.broadcast %cst_30 : f32 to vector<8x128xf32>
    %111 = arith.subf %109, %110 : vector<8x128xf32>
    %112 = arith.select %11, %111, %108 : vector<8x128xi1>, vector<8x128xf32>
    %113 = vector.extract_strided_slice %112 {offsets = [0, 0], sizes = [8, 32], strides = [1, 1]} : vector<8x128xf32> to vector<8x32xf32>
    %114 = vector.extract_strided_slice %112 {offsets = [0, 32], sizes = [8, 32], strides = [1, 1]} : vector<8x128xf32> to vector<8x32xf32>
    %115 = vector.extract_strided_slice %112 {offsets = [0, 64], sizes = [8, 32], strides = [1, 1]} : vector<8x128xf32> to vector<8x32xf32>
    %116 = vector.extract_strided_slice %112 {offsets = [0, 96], sizes = [8, 32], strides = [1, 1]} : vector<8x128xf32> to vector<8x32xf32>
    %117 = arith.mulf %114, %93 : vector<8x32xf32>
    %118 = arith.mulf %113, %115 : vector<8x32xf32>
    %119 = arith.addf %117, %118 : vector<8x32xf32>
    %120 = math.tanh %119 : vector<8x32xf32>
    %121 = arith.mulf %116, %120 : vector<8x32xf32>
    %122 = arith.truncf %121 : vector<8x32xf32> to vector<8x32xbf16>
    %c24 = arith.constant 24 : index
    %c0_31 = arith.constant 0 : index
    %123 = vector.load %arg11[%c24, %c0_31] : memref<64x32xbf16, #tpu.memory_space<vmem>>, vector<8x32xbf16>
    tpu.vector_store %arg11[%c24, %c0_31], %122 {strides = array<i32>} : memref<64x32xbf16, #tpu.memory_space<vmem>>, vector<8x32xbf16>,
    %124 = vector.extract_strided_slice %18 {offsets = [32, 0], sizes = [8, 128], strides = [1, 1]} : vector<64x128xf32> to vector<8x128xf32>
    %125 = arith.truncf %121 : vector<8x32xf32> to vector<8x32xbf16>
    %cst_32 = arith.constant dense<0.000000e+00> : vector<8x128xf32>
    %126 = tpu.matmul %125, %14, %cst_32 {dimension_numbers = #tpu.dot_dimension_numbers<[1], [0], [0], [1], [0, 0, 1, 1], [], []>} : vector<8x32xbf16>, vector<32x128xbf16>, vector<8x128xf32> -> vector<8x128xf32>
    %127 = arith.addf %124, %126 : vector<8x128xf32>
    %128 = arith.addf %127, %127 : vector<8x128xf32>
    %129 = arith.select %11, %128, %127 : vector<8x128xi1>, vector<8x128xf32>
    %130 = arith.negf %129 : vector<8x128xf32>
    %131 = math.exp %130 : vector<8x128xf32>
    %cst_33 = arith.constant 1.000000e+00 : f32
    %132 = vector.broadcast %cst_33 : f32 to vector<8x128xf32>
    %133 = arith.addf %132, %131 : vector<8x128xf32>
    %134 = arith.divf %132, %133 : vector<8x128xf32>
    %135 = arith.addf %134, %134 : vector<8x128xf32>
    %cst_34 = arith.constant 1.000000e+00 : f32
    %136 = vector.broadcast %cst_34 : f32 to vector<8x128xf32>
    %137 = arith.subf %135, %136 : vector<8x128xf32>
    %138 = arith.select %11, %137, %134 : vector<8x128xi1>, vector<8x128xf32>
    %139 = vector.extract_strided_slice %138 {offsets = [0, 0], sizes = [8, 32], strides = [1, 1]} : vector<8x128xf32> to vector<8x32xf32>
    %140 = vector.extract_strided_slice %138 {offsets = [0, 32], sizes = [8, 32], strides = [1, 1]} : vector<8x128xf32> to vector<8x32xf32>
    %141 = vector.extract_strided_slice %138 {offsets = [0, 64], sizes = [8, 32], strides = [1, 1]} : vector<8x128xf32> to vector<8x32xf32>
    %142 = vector.extract_strided_slice %138 {offsets = [0, 96], sizes = [8, 32], strides = [1, 1]} : vector<8x128xf32> to vector<8x32xf32>
    %143 = arith.mulf %140, %119 : vector<8x32xf32>
    %144 = arith.mulf %139, %141 : vector<8x32xf32>
    %145 = arith.addf %143, %144 : vector<8x32xf32>
    %146 = math.tanh %145 : vector<8x32xf32>
    %147 = arith.mulf %142, %146 : vector<8x32xf32>
    %148 = arith.truncf %147 : vector<8x32xf32> to vector<8x32xbf16>
    %c32 = arith.constant 32 : index
    %c0_35 = arith.constant 0 : index
    %149 = vector.load %arg11[%c32, %c0_35] : memref<64x32xbf16, #tpu.memory_space<vmem>>, vector<8x32xbf16>
    tpu.vector_store %arg11[%c32, %c0_35], %148 {strides = array<i32>} : memref<64x32xbf16, #tpu.memory_space<vmem>>, vector<8x32xbf16>,
    %150 = vector.extract_strided_slice %18 {offsets = [40, 0], sizes = [8, 128], strides = [1, 1]} : vector<64x128xf32> to vector<8x128xf32>
    %151 = arith.truncf %147 : vector<8x32xf32> to vector<8x32xbf16>
    %cst_36 = arith.constant dense<0.000000e+00> : vector<8x128xf32>
    %152 = tpu.matmul %151, %14, %cst_36 {dimension_numbers = #tpu.dot_dimension_numbers<[1], [0], [0], [1], [0, 0, 1, 1], [], []>} : vector<8x32xbf16>, vector<32x128xbf16>, vector<8x128xf32> -> vector<8x128xf32>
    %153 = arith.addf %150, %152 : vector<8x128xf32>
    %154 = arith.addf %153, %153 : vector<8x128xf32>
    %155 = arith.select %11, %154, %153 : vector<8x128xi1>, vector<8x128xf32>
    %156 = arith.negf %155 : vector<8x128xf32>
    %157 = math.exp %156 : vector<8x128xf32>
    %cst_37 = arith.constant 1.000000e+00 : f32
    %158 = vector.broadcast %cst_37 : f32 to vector<8x128xf32>
    %159 = arith.addf %158, %157 : vector<8x128xf32>
    %160 = arith.divf %158, %159 : vector<8x128xf32>
    %161 = arith.addf %160, %160 : vector<8x128xf32>
    %cst_38 = arith.constant 1.000000e+00 : f32
    %162 = vector.broadcast %cst_38 : f32 to vector<8x128xf32>
    %163 = arith.subf %161, %162 : vector<8x128xf32>
    %164 = arith.select %11, %163, %160 : vector<8x128xi1>, vector<8x128xf32>
    %165 = vector.extract_strided_slice %164 {offsets = [0, 0], sizes = [8, 32], strides = [1, 1]} : vector<8x128xf32> to vector<8x32xf32>
    %166 = vector.extract_strided_slice %164 {offsets = [0, 32], sizes = [8, 32], strides = [1, 1]} : vector<8x128xf32> to vector<8x32xf32>
    %167 = vector.extract_strided_slice %164 {offsets = [0, 64], sizes = [8, 32], strides = [1, 1]} : vector<8x128xf32> to vector<8x32xf32>
    %168 = vector.extract_strided_slice %164 {offsets = [0, 96], sizes = [8, 32], strides = [1, 1]} : vector<8x128xf32> to vector<8x32xf32>
    %169 = arith.mulf %166, %145 : vector<8x32xf32>
    %170 = arith.mulf %165, %167 : vector<8x32xf32>
    %171 = arith.addf %169, %170 : vector<8x32xf32>
    %172 = math.tanh %171 : vector<8x32xf32>
    %173 = arith.mulf %168, %172 : vector<8x32xf32>
    %174 = arith.truncf %173 : vector<8x32xf32> to vector<8x32xbf16>
    %c40 = arith.constant 40 : index
    %c0_39 = arith.constant 0 : index
    %175 = vector.load %arg11[%c40, %c0_39] : memref<64x32xbf16, #tpu.memory_space<vmem>>, vector<8x32xbf16>
    tpu.vector_store %arg11[%c40, %c0_39], %174 {strides = array<i32>} : memref<64x32xbf16, #tpu.memory_space<vmem>>, vector<8x32xbf16>,
    %176 = vector.extract_strided_slice %18 {offsets = [48, 0], sizes = [8, 128], strides = [1, 1]} : vector<64x128xf32> to vector<8x128xf32>
    %177 = arith.truncf %173 : vector<8x32xf32> to vector<8x32xbf16>
    %cst_40 = arith.constant dense<0.000000e+00> : vector<8x128xf32>
    %178 = tpu.matmul %177, %14, %cst_40 {dimension_numbers = #tpu.dot_dimension_numbers<[1], [0], [0], [1], [0, 0, 1, 1], [], []>} : vector<8x32xbf16>, vector<32x128xbf16>, vector<8x128xf32> -> vector<8x128xf32>
    %179 = arith.addf %176, %178 : vector<8x128xf32>
    %180 = arith.addf %179, %179 : vector<8x128xf32>
    %181 = arith.select %11, %180, %179 : vector<8x128xi1>, vector<8x128xf32>
    %182 = arith.negf %181 : vector<8x128xf32>
    %183 = math.exp %182 : vector<8x128xf32>
    %cst_41 = arith.constant 1.000000e+00 : f32
    %184 = vector.broadcast %cst_41 : f32 to vector<8x128xf32>
    %185 = arith.addf %184, %183 : vector<8x128xf32>
    %186 = arith.divf %184, %185 : vector<8x128xf32>
    %187 = arith.addf %186, %186 : vector<8x128xf32>
    %cst_42 = arith.constant 1.000000e+00 : f32
    %188 = vector.broadcast %cst_42 : f32 to vector<8x128xf32>
    %189 = arith.subf %187, %188 : vector<8x128xf32>
    %190 = arith.select %11, %189, %186 : vector<8x128xi1>, vector<8x128xf32>
    %191 = vector.extract_strided_slice %190 {offsets = [0, 0], sizes = [8, 32], strides = [1, 1]} : vector<8x128xf32> to vector<8x32xf32>
    %192 = vector.extract_strided_slice %190 {offsets = [0, 32], sizes = [8, 32], strides = [1, 1]} : vector<8x128xf32> to vector<8x32xf32>
    %193 = vector.extract_strided_slice %190 {offsets = [0, 64], sizes = [8, 32], strides = [1, 1]} : vector<8x128xf32> to vector<8x32xf32>
    %194 = vector.extract_strided_slice %190 {offsets = [0, 96], sizes = [8, 32], strides = [1, 1]} : vector<8x128xf32> to vector<8x32xf32>
    %195 = arith.mulf %192, %171 : vector<8x32xf32>
    %196 = arith.mulf %191, %193 : vector<8x32xf32>
    %197 = arith.addf %195, %196 : vector<8x32xf32>
    %198 = math.tanh %197 : vector<8x32xf32>
    %199 = arith.mulf %194, %198 : vector<8x32xf32>
    %200 = arith.truncf %199 : vector<8x32xf32> to vector<8x32xbf16>
    %c48 = arith.constant 48 : index
    %c0_43 = arith.constant 0 : index
    %201 = vector.load %arg11[%c48, %c0_43] : memref<64x32xbf16, #tpu.memory_space<vmem>>, vector<8x32xbf16>
    tpu.vector_store %arg11[%c48, %c0_43], %200 {strides = array<i32>} : memref<64x32xbf16, #tpu.memory_space<vmem>>, vector<8x32xbf16>,
    %202 = vector.extract_strided_slice %18 {offsets = [56, 0], sizes = [8, 128], strides = [1, 1]} : vector<64x128xf32> to vector<8x128xf32>
    %203 = arith.truncf %199 : vector<8x32xf32> to vector<8x32xbf16>
    %cst_44 = arith.constant dense<0.000000e+00> : vector<8x128xf32>
    %204 = tpu.matmul %203, %14, %cst_44 {dimension_numbers = #tpu.dot_dimension_numbers<[1], [0], [0], [1], [0, 0, 1, 1], [], []>} : vector<8x32xbf16>, vector<32x128xbf16>, vector<8x128xf32> -> vector<8x128xf32>
    %205 = arith.addf %202, %204 : vector<8x128xf32>
    %206 = arith.addf %205, %205 : vector<8x128xf32>
    %207 = arith.select %11, %206, %205 : vector<8x128xi1>, vector<8x128xf32>
    %208 = arith.negf %207 : vector<8x128xf32>
    %209 = math.exp %208 : vector<8x128xf32>
    %cst_45 = arith.constant 1.000000e+00 : f32
    %210 = vector.broadcast %cst_45 : f32 to vector<8x128xf32>
    %211 = arith.addf %210, %209 : vector<8x128xf32>
    %212 = arith.divf %210, %211 : vector<8x128xf32>
    %213 = arith.addf %212, %212 : vector<8x128xf32>
    %cst_46 = arith.constant 1.000000e+00 : f32
    %214 = vector.broadcast %cst_46 : f32 to vector<8x128xf32>
    %215 = arith.subf %213, %214 : vector<8x128xf32>
    %216 = arith.select %11, %215, %212 : vector<8x128xi1>, vector<8x128xf32>
    %217 = vector.extract_strided_slice %216 {offsets = [0, 0], sizes = [8, 32], strides = [1, 1]} : vector<8x128xf32> to vector<8x32xf32>
    %218 = vector.extract_strided_slice %216 {offsets = [0, 32], sizes = [8, 32], strides = [1, 1]} : vector<8x128xf32> to vector<8x32xf32>
    %219 = vector.extract_strided_slice %216 {offsets = [0, 64], sizes = [8, 32], strides = [1, 1]} : vector<8x128xf32> to vector<8x32xf32>
    %220 = vector.extract_strided_slice %216 {offsets = [0, 96], sizes = [8, 32], strides = [1, 1]} : vector<8x128xf32> to vector<8x32xf32>
    %221 = arith.mulf %218, %197 : vector<8x32xf32>
    %222 = arith.mulf %217, %219 : vector<8x32xf32>
    %223 = arith.addf %221, %222 : vector<8x32xf32>
    %224 = math.tanh %223 : vector<8x32xf32>
    %225 = arith.mulf %220, %224 : vector<8x32xf32>
    %226 = arith.truncf %225 : vector<8x32xf32> to vector<8x32xbf16>
    %c56 = arith.constant 56 : index
    %c0_47 = arith.constant 0 : index
    %227 = vector.load %arg11[%c56, %c0_47] : memref<64x32xbf16, #tpu.memory_space<vmem>>, vector<8x32xbf16>
    tpu.vector_store %arg11[%c56, %c0_47], %226 {strides = array<i32>} : memref<64x32xbf16, #tpu.memory_space<vmem>>, vector<8x32xbf16>,
    %c0_48 = arith.constant 0 : index
    %c0_49 = arith.constant 0 : index
    %228 = vector.load %arg11[%c0_48, %c0_49] : memref<64x32xbf16, #tpu.memory_space<vmem>>, vector<64x32xbf16>
    %c0_50 = arith.constant 0 : index
    %c0_51 = arith.constant 0 : index
    %229 = vector.load %arg7[%c0_50, %c0_51] : memref<32x128xbf16, #tpu.memory_space<vmem>>, vector<32x128xbf16>
    %c0_52 = arith.constant 0 : index
    %c0_53 = arith.constant 0 : index
    %230 = vector.load %arg8[%c0_52, %c0_53] : memref<32x128xbf16, #tpu.memory_space<vmem>>, vector<32x128xbf16>
    %c0_54 = arith.constant 0 : index
    %c0_55 = arith.constant 0 : index
    %231 = vector.load %arg9[%c0_54, %c0_55] : memref<1x128xf32, #tpu.memory_space<vmem>>, vector<1x128xf32>
    %cst_56 = arith.constant dense<0.000000e+00> : vector<64x128xf32>
    %232 = tpu.matmul %228, %229, %cst_56 {dimension_numbers = #tpu.dot_dimension_numbers<[1], [0], [0], [1], [0, 0, 1, 1], [], []>} : vector<64x32xbf16>, vector<32x128xbf16>, vector<64x128xf32> -> vector<64x128xf32>
    %233 = vector.broadcast %231 : vector<1x128xf32> to vector<64x128xf32>
    %234 = arith.addf %232, %233 : vector<64x128xf32>
    %cst_57 = arith.constant 0.000000e+00 : f32
    %235 = vector.broadcast %cst_57 : f32 to vector<8x32xf32>
    %236 = vector.extract_strided_slice %234 {offsets = [0, 0], sizes = [8, 128], strides = [1, 1]} : vector<64x128xf32> to vector<8x128xf32>
    %237 = arith.truncf %5 : vector<8x32xf32> to vector<8x32xbf16>
    %cst_58 = arith.constant dense<0.000000e+00> : vector<8x128xf32>
    %238 = tpu.matmul %237, %230, %cst_58 {dimension_numbers = #tpu.dot_dimension_numbers<[1], [0], [0], [1], [0, 0, 1, 1], [], []>} : vector<8x32xbf16>, vector<32x128xbf16>, vector<8x128xf32> -> vector<8x128xf32>
    %239 = arith.addf %236, %238 : vector<8x128xf32>
    %240 = arith.addf %239, %239 : vector<8x128xf32>
    %241 = arith.select %11, %240, %239 : vector<8x128xi1>, vector<8x128xf32>
    %242 = arith.negf %241 : vector<8x128xf32>
    %243 = math.exp %242 : vector<8x128xf32>
    %cst_59 = arith.constant 1.000000e+00 : f32
    %244 = vector.broadcast %cst_59 : f32 to vector<8x128xf32>
    %245 = arith.addf %244, %243 : vector<8x128xf32>
    %246 = arith.divf %244, %245 : vector<8x128xf32>
    %247 = arith.addf %246, %246 : vector<8x128xf32>
    %cst_60 = arith.constant 1.000000e+00 : f32
    %248 = vector.broadcast %cst_60 : f32 to vector<8x128xf32>
    %249 = arith.subf %247, %248 : vector<8x128xf32>
    %250 = arith.select %11, %249, %246 : vector<8x128xi1>, vector<8x128xf32>
    %251 = vector.extract_strided_slice %250 {offsets = [0, 0], sizes = [8, 32], strides = [1, 1]} : vector<8x128xf32> to vector<8x32xf32>
    %252 = vector.extract_strided_slice %250 {offsets = [0, 32], sizes = [8, 32], strides = [1, 1]} : vector<8x128xf32> to vector<8x32xf32>
    %253 = vector.extract_strided_slice %250 {offsets = [0, 64], sizes = [8, 32], strides = [1, 1]} : vector<8x128xf32> to vector<8x32xf32>
    %254 = vector.extract_strided_slice %250 {offsets = [0, 96], sizes = [8, 32], strides = [1, 1]} : vector<8x128xf32> to vector<8x32xf32>
    %255 = arith.mulf %252, %235 : vector<8x32xf32>
    %256 = arith.mulf %251, %253 : vector<8x32xf32>
    %257 = arith.addf %255, %256 : vector<8x32xf32>
    %258 = math.tanh %257 : vector<8x32xf32>
    %259 = arith.mulf %254, %258 : vector<8x32xf32>
    %c0_61 = arith.constant 0 : index
    %c0_62 = arith.constant 0 : index
    %260 = vector.load %arg10[%c0_61, %c0_62] : memref<8x256xf32, #tpu.memory_space<vmem>>, vector<8x32xf32>
    tpu.vector_store %arg10[%c0_61, %c0_62], %259 {strides = array<i32>} : memref<8x256xf32, #tpu.memory_space<vmem>>, vector<8x32xf32>,
    %261 = vector.extract_strided_slice %234 {offsets = [8, 0], sizes = [8, 128], strides = [1, 1]} : vector<64x128xf32> to vector<8x128xf32>
    %262 = arith.truncf %259 : vector<8x32xf32> to vector<8x32xbf16>
    %cst_63 = arith.constant dense<0.000000e+00> : vector<8x128xf32>
    %263 = tpu.matmul %262, %230, %cst_63 {dimension_numbers = #tpu.dot_dimension_numbers<[1], [0], [0], [1], [0, 0, 1, 1], [], []>} : vector<8x32xbf16>, vector<32x128xbf16>, vector<8x128xf32> -> vector<8x128xf32>
    %264 = arith.addf %261, %263 : vector<8x128xf32>
    %265 = arith.addf %264, %264 : vector<8x128xf32>
    %266 = arith.select %11, %265, %264 : vector<8x128xi1>, vector<8x128xf32>
    %267 = arith.negf %266 : vector<8x128xf32>
    %268 = math.exp %267 : vector<8x128xf32>
    %cst_64 = arith.constant 1.000000e+00 : f32
    %269 = vector.broadcast %cst_64 : f32 to vector<8x128xf32>
    %270 = arith.addf %269, %268 : vector<8x128xf32>
    %271 = arith.divf %269, %270 : vector<8x128xf32>
    %272 = arith.addf %271, %271 : vector<8x128xf32>
    %cst_65 = arith.constant 1.000000e+00 : f32
    %273 = vector.broadcast %cst_65 : f32 to vector<8x128xf32>
    %274 = arith.subf %272, %273 : vector<8x128xf32>
    %275 = arith.select %11, %274, %271 : vector<8x128xi1>, vector<8x128xf32>
    %276 = vector.extract_strided_slice %275 {offsets = [0, 0], sizes = [8, 32], strides = [1, 1]} : vector<8x128xf32> to vector<8x32xf32>
    %277 = vector.extract_strided_slice %275 {offsets = [0, 32], sizes = [8, 32], strides = [1, 1]} : vector<8x128xf32> to vector<8x32xf32>
    %278 = vector.extract_strided_slice %275 {offsets = [0, 64], sizes = [8, 32], strides = [1, 1]} : vector<8x128xf32> to vector<8x32xf32>
    %279 = vector.extract_strided_slice %275 {offsets = [0, 96], sizes = [8, 32], strides = [1, 1]} : vector<8x128xf32> to vector<8x32xf32>
    %280 = arith.mulf %277, %257 : vector<8x32xf32>
    %281 = arith.mulf %276, %278 : vector<8x32xf32>
    %282 = arith.addf %280, %281 : vector<8x32xf32>
    %283 = math.tanh %282 : vector<8x32xf32>
    %284 = arith.mulf %279, %283 : vector<8x32xf32>
    %c0_66 = arith.constant 0 : index
    %c32_67 = arith.constant 32 : index
    %285 = vector.load %arg10[%c0_66, %c32_67] : memref<8x256xf32, #tpu.memory_space<vmem>>, vector<8x32xf32>
    tpu.vector_store %arg10[%c0_66, %c32_67], %284 {strides = array<i32>} : memref<8x256xf32, #tpu.memory_space<vmem>>, vector<8x32xf32>,
    %286 = vector.extract_strided_slice %234 {offsets = [16, 0], sizes = [8, 128], strides = [1, 1]} : vector<64x128xf32> to vector<8x128xf32>
    %287 = arith.truncf %284 : vector<8x32xf32> to vector<8x32xbf16>
    %cst_68 = arith.constant dense<0.000000e+00> : vector<8x128xf32>
    %288 = tpu.matmul %287, %230, %cst_68 {dimension_numbers = #tpu.dot_dimension_numbers<[1], [0], [0], [1], [0, 0, 1, 1], [], []>} : vector<8x32xbf16>, vector<32x128xbf16>, vector<8x128xf32> -> vector<8x128xf32>
    %289 = arith.addf %286, %288 : vector<8x128xf32>
    %290 = arith.addf %289, %289 : vector<8x128xf32>
    %291 = arith.select %11, %290, %289 : vector<8x128xi1>, vector<8x128xf32>
    %292 = arith.negf %291 : vector<8x128xf32>
    %293 = math.exp %292 : vector<8x128xf32>
    %cst_69 = arith.constant 1.000000e+00 : f32
    %294 = vector.broadcast %cst_69 : f32 to vector<8x128xf32>
    %295 = arith.addf %294, %293 : vector<8x128xf32>
    %296 = arith.divf %294, %295 : vector<8x128xf32>
    %297 = arith.addf %296, %296 : vector<8x128xf32>
    %cst_70 = arith.constant 1.000000e+00 : f32
    %298 = vector.broadcast %cst_70 : f32 to vector<8x128xf32>
    %299 = arith.subf %297, %298 : vector<8x128xf32>
    %300 = arith.select %11, %299, %296 : vector<8x128xi1>, vector<8x128xf32>
    %301 = vector.extract_strided_slice %300 {offsets = [0, 0], sizes = [8, 32], strides = [1, 1]} : vector<8x128xf32> to vector<8x32xf32>
    %302 = vector.extract_strided_slice %300 {offsets = [0, 32], sizes = [8, 32], strides = [1, 1]} : vector<8x128xf32> to vector<8x32xf32>
    %303 = vector.extract_strided_slice %300 {offsets = [0, 64], sizes = [8, 32], strides = [1, 1]} : vector<8x128xf32> to vector<8x32xf32>
    %304 = vector.extract_strided_slice %300 {offsets = [0, 96], sizes = [8, 32], strides = [1, 1]} : vector<8x128xf32> to vector<8x32xf32>
    %305 = arith.mulf %302, %282 : vector<8x32xf32>
    %306 = arith.mulf %301, %303 : vector<8x32xf32>
    %307 = arith.addf %305, %306 : vector<8x32xf32>
    %308 = math.tanh %307 : vector<8x32xf32>
    %309 = arith.mulf %304, %308 : vector<8x32xf32>
    %c0_71 = arith.constant 0 : index
    %c64 = arith.constant 64 : index
    %310 = vector.load %arg10[%c0_71, %c64] : memref<8x256xf32, #tpu.memory_space<vmem>>, vector<8x32xf32>
    tpu.vector_store %arg10[%c0_71, %c64], %309 {strides = array<i32>} : memref<8x256xf32, #tpu.memory_space<vmem>>, vector<8x32xf32>,
    %311 = vector.extract_strided_slice %234 {offsets = [24, 0], sizes = [8, 128], strides = [1, 1]} : vector<64x128xf32> to vector<8x128xf32>
    %312 = arith.truncf %309 : vector<8x32xf32> to vector<8x32xbf16>
    %cst_72 = arith.constant dense<0.000000e+00> : vector<8x128xf32>
    %313 = tpu.matmul %312, %230, %cst_72 {dimension_numbers = #tpu.dot_dimension_numbers<[1], [0], [0], [1], [0, 0, 1, 1], [], []>} : vector<8x32xbf16>, vector<32x128xbf16>, vector<8x128xf32> -> vector<8x128xf32>
    %314 = arith.addf %311, %313 : vector<8x128xf32>
    %315 = arith.addf %314, %314 : vector<8x128xf32>
    %316 = arith.select %11, %315, %314 : vector<8x128xi1>, vector<8x128xf32>
    %317 = arith.negf %316 : vector<8x128xf32>
    %318 = math.exp %317 : vector<8x128xf32>
    %cst_73 = arith.constant 1.000000e+00 : f32
    %319 = vector.broadcast %cst_73 : f32 to vector<8x128xf32>
    %320 = arith.addf %319, %318 : vector<8x128xf32>
    %321 = arith.divf %319, %320 : vector<8x128xf32>
    %322 = arith.addf %321, %321 : vector<8x128xf32>
    %cst_74 = arith.constant 1.000000e+00 : f32
    %323 = vector.broadcast %cst_74 : f32 to vector<8x128xf32>
    %324 = arith.subf %322, %323 : vector<8x128xf32>
    %325 = arith.select %11, %324, %321 : vector<8x128xi1>, vector<8x128xf32>
    %326 = vector.extract_strided_slice %325 {offsets = [0, 0], sizes = [8, 32], strides = [1, 1]} : vector<8x128xf32> to vector<8x32xf32>
    %327 = vector.extract_strided_slice %325 {offsets = [0, 32], sizes = [8, 32], strides = [1, 1]} : vector<8x128xf32> to vector<8x32xf32>
    %328 = vector.extract_strided_slice %325 {offsets = [0, 64], sizes = [8, 32], strides = [1, 1]} : vector<8x128xf32> to vector<8x32xf32>
    %329 = vector.extract_strided_slice %325 {offsets = [0, 96], sizes = [8, 32], strides = [1, 1]} : vector<8x128xf32> to vector<8x32xf32>
    %330 = arith.mulf %327, %307 : vector<8x32xf32>
    %331 = arith.mulf %326, %328 : vector<8x32xf32>
    %332 = arith.addf %330, %331 : vector<8x32xf32>
    %333 = math.tanh %332 : vector<8x32xf32>
    %334 = arith.mulf %329, %333 : vector<8x32xf32>
    %c0_75 = arith.constant 0 : index
    %c96 = arith.constant 96 : index
    %335 = vector.load %arg10[%c0_75, %c96] : memref<8x256xf32, #tpu.memory_space<vmem>>, vector<8x32xf32>
    tpu.vector_store %arg10[%c0_75, %c96], %334 {strides = array<i32>} : memref<8x256xf32, #tpu.memory_space<vmem>>, vector<8x32xf32>,
    %336 = vector.extract_strided_slice %234 {offsets = [32, 0], sizes = [8, 128], strides = [1, 1]} : vector<64x128xf32> to vector<8x128xf32>
    %337 = arith.truncf %334 : vector<8x32xf32> to vector<8x32xbf16>
    %cst_76 = arith.constant dense<0.000000e+00> : vector<8x128xf32>
    %338 = tpu.matmul %337, %230, %cst_76 {dimension_numbers = #tpu.dot_dimension_numbers<[1], [0], [0], [1], [0, 0, 1, 1], [], []>} : vector<8x32xbf16>, vector<32x128xbf16>, vector<8x128xf32> -> vector<8x128xf32>
    %339 = arith.addf %336, %338 : vector<8x128xf32>
    %340 = arith.addf %339, %339 : vector<8x128xf32>
    %341 = arith.select %11, %340, %339 : vector<8x128xi1>, vector<8x128xf32>
    %342 = arith.negf %341 : vector<8x128xf32>
    %343 = math.exp %342 : vector<8x128xf32>
    %cst_77 = arith.constant 1.000000e+00 : f32
    %344 = vector.broadcast %cst_77 : f32 to vector<8x128xf32>
    %345 = arith.addf %344, %343 : vector<8x128xf32>
    %346 = arith.divf %344, %345 : vector<8x128xf32>
    %347 = arith.addf %346, %346 : vector<8x128xf32>
    %cst_78 = arith.constant 1.000000e+00 : f32
    %348 = vector.broadcast %cst_78 : f32 to vector<8x128xf32>
    %349 = arith.subf %347, %348 : vector<8x128xf32>
    %350 = arith.select %11, %349, %346 : vector<8x128xi1>, vector<8x128xf32>
    %351 = vector.extract_strided_slice %350 {offsets = [0, 0], sizes = [8, 32], strides = [1, 1]} : vector<8x128xf32> to vector<8x32xf32>
    %352 = vector.extract_strided_slice %350 {offsets = [0, 32], sizes = [8, 32], strides = [1, 1]} : vector<8x128xf32> to vector<8x32xf32>
    %353 = vector.extract_strided_slice %350 {offsets = [0, 64], sizes = [8, 32], strides = [1, 1]} : vector<8x128xf32> to vector<8x32xf32>
    %354 = vector.extract_strided_slice %350 {offsets = [0, 96], sizes = [8, 32], strides = [1, 1]} : vector<8x128xf32> to vector<8x32xf32>
    %355 = arith.mulf %352, %332 : vector<8x32xf32>
    %356 = arith.mulf %351, %353 : vector<8x32xf32>
    %357 = arith.addf %355, %356 : vector<8x32xf32>
    %358 = math.tanh %357 : vector<8x32xf32>
    %359 = arith.mulf %354, %358 : vector<8x32xf32>
    %c0_79 = arith.constant 0 : index
    %c128 = arith.constant 128 : index
    %360 = vector.load %arg10[%c0_79, %c128] : memref<8x256xf32, #tpu.memory_space<vmem>>, vector<8x32xf32>
    tpu.vector_store %arg10[%c0_79, %c128], %359 {strides = array<i32>} : memref<8x256xf32, #tpu.memory_space<vmem>>, vector<8x32xf32>,
    %361 = vector.extract_strided_slice %234 {offsets = [40, 0], sizes = [8, 128], strides = [1, 1]} : vector<64x128xf32> to vector<8x128xf32>
    %362 = arith.truncf %359 : vector<8x32xf32> to vector<8x32xbf16>
    %cst_80 = arith.constant dense<0.000000e+00> : vector<8x128xf32>
    %363 = tpu.matmul %362, %230, %cst_80 {dimension_numbers = #tpu.dot_dimension_numbers<[1], [0], [0], [1], [0, 0, 1, 1], [], []>} : vector<8x32xbf16>, vector<32x128xbf16>, vector<8x128xf32> -> vector<8x128xf32>
    %364 = arith.addf %361, %363 : vector<8x128xf32>
    %365 = arith.addf %364, %364 : vector<8x128xf32>
    %366 = arith.select %11, %365, %364 : vector<8x128xi1>, vector<8x128xf32>
    %367 = arith.negf %366 : vector<8x128xf32>
    %368 = math.exp %367 : vector<8x128xf32>
    %cst_81 = arith.constant 1.000000e+00 : f32
    %369 = vector.broadcast %cst_81 : f32 to vector<8x128xf32>
    %370 = arith.addf %369, %368 : vector<8x128xf32>
    %371 = arith.divf %369, %370 : vector<8x128xf32>
    %372 = arith.addf %371, %371 : vector<8x128xf32>
    %cst_82 = arith.constant 1.000000e+00 : f32
    %373 = vector.broadcast %cst_82 : f32 to vector<8x128xf32>
    %374 = arith.subf %372, %373 : vector<8x128xf32>
    %375 = arith.select %11, %374, %371 : vector<8x128xi1>, vector<8x128xf32>
    %376 = vector.extract_strided_slice %375 {offsets = [0, 0], sizes = [8, 32], strides = [1, 1]} : vector<8x128xf32> to vector<8x32xf32>
    %377 = vector.extract_strided_slice %375 {offsets = [0, 32], sizes = [8, 32], strides = [1, 1]} : vector<8x128xf32> to vector<8x32xf32>
    %378 = vector.extract_strided_slice %375 {offsets = [0, 64], sizes = [8, 32], strides = [1, 1]} : vector<8x128xf32> to vector<8x32xf32>
    %379 = vector.extract_strided_slice %375 {offsets = [0, 96], sizes = [8, 32], strides = [1, 1]} : vector<8x128xf32> to vector<8x32xf32>
    %380 = arith.mulf %377, %357 : vector<8x32xf32>
    %381 = arith.mulf %376, %378 : vector<8x32xf32>
    %382 = arith.addf %380, %381 : vector<8x32xf32>
    %383 = math.tanh %382 : vector<8x32xf32>
    %384 = arith.mulf %379, %383 : vector<8x32xf32>
    %c0_83 = arith.constant 0 : index
    %c160 = arith.constant 160 : index
    %385 = vector.load %arg10[%c0_83, %c160] : memref<8x256xf32, #tpu.memory_space<vmem>>, vector<8x32xf32>
    tpu.vector_store %arg10[%c0_83, %c160], %384 {strides = array<i32>} : memref<8x256xf32, #tpu.memory_space<vmem>>, vector<8x32xf32>,
    %386 = vector.extract_strided_slice %234 {offsets = [48, 0], sizes = [8, 128], strides = [1, 1]} : vector<64x128xf32> to vector<8x128xf32>
    %387 = arith.truncf %384 : vector<8x32xf32> to vector<8x32xbf16>
    %cst_84 = arith.constant dense<0.000000e+00> : vector<8x128xf32>
    %388 = tpu.matmul %387, %230, %cst_84 {dimension_numbers = #tpu.dot_dimension_numbers<[1], [0], [0], [1], [0, 0, 1, 1], [], []>} : vector<8x32xbf16>, vector<32x128xbf16>, vector<8x128xf32> -> vector<8x128xf32>
    %389 = arith.addf %386, %388 : vector<8x128xf32>
    %390 = arith.addf %389, %389 : vector<8x128xf32>
    %391 = arith.select %11, %390, %389 : vector<8x128xi1>, vector<8x128xf32>
    %392 = arith.negf %391 : vector<8x128xf32>
    %393 = math.exp %392 : vector<8x128xf32>
    %cst_85 = arith.constant 1.000000e+00 : f32
    %394 = vector.broadcast %cst_85 : f32 to vector<8x128xf32>
    %395 = arith.addf %394, %393 : vector<8x128xf32>
    %396 = arith.divf %394, %395 : vector<8x128xf32>
    %397 = arith.addf %396, %396 : vector<8x128xf32>
    %cst_86 = arith.constant 1.000000e+00 : f32
    %398 = vector.broadcast %cst_86 : f32 to vector<8x128xf32>
    %399 = arith.subf %397, %398 : vector<8x128xf32>
    %400 = arith.select %11, %399, %396 : vector<8x128xi1>, vector<8x128xf32>
    %401 = vector.extract_strided_slice %400 {offsets = [0, 0], sizes = [8, 32], strides = [1, 1]} : vector<8x128xf32> to vector<8x32xf32>
    %402 = vector.extract_strided_slice %400 {offsets = [0, 32], sizes = [8, 32], strides = [1, 1]} : vector<8x128xf32> to vector<8x32xf32>
    %403 = vector.extract_strided_slice %400 {offsets = [0, 64], sizes = [8, 32], strides = [1, 1]} : vector<8x128xf32> to vector<8x32xf32>
    %404 = vector.extract_strided_slice %400 {offsets = [0, 96], sizes = [8, 32], strides = [1, 1]} : vector<8x128xf32> to vector<8x32xf32>
    %405 = arith.mulf %402, %382 : vector<8x32xf32>
    %406 = arith.mulf %401, %403 : vector<8x32xf32>
    %407 = arith.addf %405, %406 : vector<8x32xf32>
    %408 = math.tanh %407 : vector<8x32xf32>
    %409 = arith.mulf %404, %408 : vector<8x32xf32>
    %c0_87 = arith.constant 0 : index
    %c192 = arith.constant 192 : index
    %410 = vector.load %arg10[%c0_87, %c192] : memref<8x256xf32, #tpu.memory_space<vmem>>, vector<8x32xf32>
    tpu.vector_store %arg10[%c0_87, %c192], %409 {strides = array<i32>} : memref<8x256xf32, #tpu.memory_space<vmem>>, vector<8x32xf32>,
    %411 = vector.extract_strided_slice %234 {offsets = [56, 0], sizes = [8, 128], strides = [1, 1]} : vector<64x128xf32> to vector<8x128xf32>
    %412 = arith.truncf %409 : vector<8x32xf32> to vector<8x32xbf16>
    %cst_88 = arith.constant dense<0.000000e+00> : vector<8x128xf32>
    %413 = tpu.matmul %412, %230, %cst_88 {dimension_numbers = #tpu.dot_dimension_numbers<[1], [0], [0], [1], [0, 0, 1, 1], [], []>} : vector<8x32xbf16>, vector<32x128xbf16>, vector<8x128xf32> -> vector<8x128xf32>
    %414 = arith.addf %411, %413 : vector<8x128xf32>
    %415 = arith.addf %414, %414 : vector<8x128xf32>
    %416 = arith.select %11, %415, %414 : vector<8x128xi1>, vector<8x128xf32>
    %417 = arith.negf %416 : vector<8x128xf32>
    %418 = math.exp %417 : vector<8x128xf32>
    %cst_89 = arith.constant 1.000000e+00 : f32
    %419 = vector.broadcast %cst_89 : f32 to vector<8x128xf32>
    %420 = arith.addf %419, %418 : vector<8x128xf32>
    %421 = arith.divf %419, %420 : vector<8x128xf32>
    %422 = arith.addf %421, %421 : vector<8x128xf32>
    %cst_90 = arith.constant 1.000000e+00 : f32
    %423 = vector.broadcast %cst_90 : f32 to vector<8x128xf32>
    %424 = arith.subf %422, %423 : vector<8x128xf32>
    %425 = arith.select %11, %424, %421 : vector<8x128xi1>, vector<8x128xf32>
    %426 = vector.extract_strided_slice %425 {offsets = [0, 0], sizes = [8, 32], strides = [1, 1]} : vector<8x128xf32> to vector<8x32xf32>
    %427 = vector.extract_strided_slice %425 {offsets = [0, 32], sizes = [8, 32], strides = [1, 1]} : vector<8x128xf32> to vector<8x32xf32>
    %428 = vector.extract_strided_slice %425 {offsets = [0, 64], sizes = [8, 32], strides = [1, 1]} : vector<8x128xf32> to vector<8x32xf32>
    %429 = vector.extract_strided_slice %425 {offsets = [0, 96], sizes = [8, 32], strides = [1, 1]} : vector<8x128xf32> to vector<8x32xf32>
    %430 = arith.mulf %427, %407 : vector<8x32xf32>
    %431 = arith.mulf %426, %428 : vector<8x32xf32>
    %432 = arith.addf %430, %431 : vector<8x32xf32>
    %433 = math.tanh %432 : vector<8x32xf32>
    %434 = arith.mulf %429, %433 : vector<8x32xf32>
    %c0_91 = arith.constant 0 : index
    %c224 = arith.constant 224 : index
    %435 = vector.load %arg10[%c0_91, %c224] : memref<8x256xf32, #tpu.memory_space<vmem>>, vector<8x32xf32>
    tpu.vector_store %arg10[%c0_91, %c224], %434 {strides = array<i32>} : memref<8x256xf32, #tpu.memory_space<vmem>>, vector<8x32xf32>,
    return
  }
}

</mosaic_0001>

<bundles_post_ra>
// kernel: text_fe_forward.1
= control target key start
LH: loop header
LB: loop body
LE: loop exit
PB: predicated region body
PF: predicated region fallthrough
CT: control target
= control target key end

     0   :  { %v2686_v46 = vmov 0.0   ;;  %vm2687_vm0 = vmmov 0   ;;  %vm650_vm1 = vcmask 261120   ;;  %s2689_s16 = smov 32   ;;  %vm730_vm5 = vcmask 257024   ;;  %s3353_s2 = inlined_call_operand.vmem [shape: bf16[256,32], index: 2, kind: input, shape index: {}]   ;;  %s3354_s1 = inlined_call_operand.vmem [shape: bf16[8,256], index: 1, kind: input, shape index: {}]   ;;  %s3355_s4 = inlined_call_operand.vmem [shape: bf16[384,128], index: 4, kind: input, shape index: {}]   ;;  %s3356_s0 = inlined_call_operand.vmem [shape: bf16[64,384], index: 0, kind: input, shape index: {}]   ;;  %s3357_s5 = inlined_call_operand.vmem [shape: bf16[32,128], index: 5, kind: input, shape index: {}]   ;;  %s3358_s3 = inlined_call_operand.vmem [shape: f32[1,32], index: 3, kind: input, shape index: {}]   ;;  %s3359_s6 = inlined_call_operand.vmem [shape: f32[1,128], index: 6, kind: input, shape index: {}]   ;;  %s3360_s7 = inlined_call_operand.vmem [shape: bf16[32,128], index: 7, kind: input, shape index: {}]   ;;  %s3361_s8 = inlined_call_operand.vmem [shape: bf16[32,128], index: 8, kind: input, shape index: {}]   ;;  %s3362_s9 = inlined_call_operand.vmem [shape: f32[1,128], index: 9, kind: input, shape index: {}]   ;;  %s3363_s10 = inlined_call_operand.vmem [shape: f32[8,256], index: 10, kind: output, shape index: {}]  }
   0x1   :  { %v2522_v0 = vld [vmem:[%s3353_s2 + $0x78] sm:$0xff]   ;;  %v2524_v2 = vld [vmem:[%s3353_s2 + $0x70] sm:$0xff]   ;;  %v2526_v4 = vld [vmem:[%s3353_s2 + $0x68] sm:$0xff]   ;;  %vm1604_vm6 = vcmask 523520   ;;  %vm1686_vm7 = vcmask 785920   ;;  %vm1764_vm8 = vcmask 1048320  }
   0x2   :  { %v2523_v1 = vld [vmem:[%s3353_s2 + $0x38] sm:$0xff]   ;;  %2225 = vmatprep.subr.bf16.mxu0 %v2522_v0  ;;  %v2525_v3 = vld [vmem:[%s3353_s2 + $0x30] sm:$0xff]   ;;  %v2527_v5 = vld [vmem:[%s3353_s2 + $0x28] sm:$0xff]  }
   0x3   :  { %2226 = vmatpush3.bf16.msra.mxu0 %v2523_v1  ;;  %v2528_v6 = vld [vmem:[%s3353_s2 + $0x60] sm:$0xff]   ;;  %v2530_v8 = vld [vmem:[%s3353_s2 + $0x58] sm:$0xff]   ;;  %v2532_v10 = vld [vmem:[%s3353_s2 + $0x50] sm:$0xff]  }
   0x4   :  { %2227 = vmatprep.subr.bf16.mxu0 %v2524_v2  ;;  %v2529_v7 = vld [vmem:[%s3353_s2 + $0x20] sm:$0xff]   ;;  %v2531_v9 = vld [vmem:[%s3353_s2 + $0x18] sm:$0xff]   ;;  %v2533_v12 = vld [vmem:[%s3353_s2 + $0x10] sm:$0xff]  }
   0x5   :  { %v36_v11 = vld [vmem:[%s3354_s1] sm:$0xff]  ;;  %v2540_v14 = vld [vmem:[%s3355_s4 + $0x78] sm:$0xff]   ;;  %v2542_v16 = vld [vmem:[%s3355_s4 + $0x70] sm:$0xff]  }
   0x6   :  { %v2092_v13 = vcombine.high %v36_v11, %v36_v11  ;;  %v2541_v15 = vld [vmem:[%s3355_s4 + $0x38] sm:$0xff]   ;;  %v2534_v17 = vld [vmem:[%s3353_s2 + $0x48] sm:$0xff]   ;;  %2247 = vmatprep.subr.bf16.mxu1 %v2540_v14  ;;  %v2544_v18 = vld [vmem:[%s3355_s4 + $0x30] sm:$0xff]   ;;  %v2091_v27 = vcombine.low %v36_v11, %v36_v11 }
   0x7   :  { %2228 = vmatpush3.bf16.msra.mxu0 %v2525_v3  ;;  %2248 = vmatpush3.bf16.msra.mxu1 %v2541_v15  ;;  %v2545_v19 = vld [vmem:[%s3355_s4 + $0x68] sm:$0xff]   ;;  %v2536_v21 = vld [vmem:[%s3353_s2 + $0x40] sm:$0xff]   ;;  %v2543_v25 = vld [vmem:[%s3355_s4 + $0xb8] sm:$0xff]  }
   0x8   :  { %2229 = vmatprep.subr.bf16.mxu0 %v2526_v4  ;;  %211 = vmatprep.mubr.bf16.mxu0 %v2092_v13  ;;  %v2535_v20 = vld [vmem:[%s3353_s2 + $0x8] sm:$0xff]   ;;  %v2548_v23 = vld [vmem:[%s3355_s4 + $0x60] sm:$0xff]   ;;  %v2551_v28 = vld [vmem:[%s3355_s4 + $0x58] sm:$0xff]  }
   0x9   :  { %2249 = vmatprep.subr.bf16.mxu1 %v2542_v16  ;;  %v2547_v22 = vld [vmem:[%s3355_s4 + $0x28] sm:$0xff]   ;;  %v2537_v24 = vld [vmem:[%s3353_s2] sm:$0xff]   ;;  %v2546_v29 = vld [vmem:[%s3355_s4 + $0xb0] sm:$0xff]  }
   0xa   :  { %v2550_v26 = vld [vmem:[%s3355_s4 + $0x20] sm:$0xff]   ;;  %v2553_v30 = vld [vmem:[%s3355_s4 + $0x18] sm:$0xff]   ;;  %v2554_v31 = vld [vmem:[%s3355_s4 + $0x50] sm:$0xff]  }
   0xb   :  { %2230 = vmatpush3.bf16.msra.mxu0 %v2527_v5  ;;  %2250 = vmatpush3.bf16.msra.mxu1 %v2544_v18  ;;  %v2549_v32 = vld [vmem:[%s3355_s4 + $0xa8] sm:$0xff]   ;;  %v2556_v33 = vld [vmem:[%s3355_s4 + $0x10] sm:$0xff]   ;;  %v2552_v35 = vld [vmem:[%s3355_s4 + $0xa0] sm:$0xff]  }
   0xc   :  { %2231 = vmatprep.subr.bf16.mxu0 %v2528_v6  ;;  %2251 = vmatprep.subr.bf16.mxu1 %v2545_v19  ;;  %v2557_v34 = vld [vmem:[%s3355_s4 + $0x48] sm:$0xff]   ;;  %v2565_v37 = vld [vmem:[%s3356_s0 + $0x4] ss:$12 sps:$4 sm:$0xff]   ;;  %v2555_v40 = vld [vmem:[%s3355_s4 + $0x98] sm:$0xff]  }
   0xd   :  { %v2559_v36 = vld [vmem:[%s3355_s4 + $0x8] sm:$0xff]   ;;  %v2560_v38 = vld [vmem:[%s3355_s4 + $0x40] sm:$0xff]   ;;  %539 = vmatprep.mubr.bf16.mxu1 %v2565_v37  ;;  %v2558_v42 = vld [vmem:[%s3355_s4 + $0x90] sm:$0xff]  }
   0xe   :  { %v2567_v39 = vld [vmem:[%s3356_s0 + $0x8] ss:$12 sps:$4 sm:$0xff]   ;;  %v2562_v41 = vld [vmem:[%s3355_s4] sm:$0xff]   ;;  %v2575_v54 = vld [vmem:[%s3356_s0 + $0x30] ss:$12 sps:$4 sm:$0xff]  }
   0xf   :  { %2232 = vmatpush3.bf16.msra.mxu0 %v2529_v7  ;;  %2252 = vmatpush3.bf16.msra.mxu1 %v2547_v22  ;;  %v2563_v43 = vld [vmem:[%s3356_s0] ss:$12 sps:$4 sm:$0xff]   ;;  %v2570_v45 = vld [vmem:[%s3356_s0 + $0x1c] ss:$12 sps:$4 sm:$0xff]   ;;  %v2572_v50 = vld [vmem:[%s3356_s0 + $0x18] ss:$12 sps:$4 sm:$0xff]  }
  0x10   :  { %2233 = vmatprep.subr.bf16.mxu0 %v2530_v8  ;;  %2253 = vmatprep.subr.bf16.mxu1 %v2548_v23  ;;  %v2875_v44 = vld [vmem:[%s3357_s5 + $0x8] sm:$0xff]   ;;  %v2888_v48 = vld [vmem:[%s3357_s5] sm:$0xff]   ;;  %v2577_v56 = vld [vmem:[%s3356_s0 + $0x50] ss:$12 sps:$4 sm:$0xff]  }
  0x11   :  { %v2561_v47 = vld [vmem:[%s3355_s4 + $0x88] sm:$0xff]   ;;  %v2566_v49 = vld [vmem:[%s3355_s4 + $0x80] sm:$0xff]   ;;  %s2690_s4 = smov 96  }
  0x12   :  { %v2573_v51 = vld [vmem:[%s3356_s0 + $0x34] ss:$12 sps:$4 sm:$0xff]   ;;  %v2576_v53 = vld [vmem:[%s3356_s0 + $0x38] ss:$12 sps:$4 sm:$0xff]  }
  0x13   :  { %2234 = vmatpush3.bf16.msra.mxu0 %v2531_v9  ;;  %2254 = vmatpush3.bf16.msra.mxu1 %v2550_v26  ;;  %v2568_v52 = vld [vmem:[%s3356_s0 + $0x20] ss:$12 sps:$4 sm:$0xff]   ;;  %v2581_v57 = vld [vmem:[%s3356_s0 + $0x48] ss:$12 sps:$4 sm:$0xff]  }
  0x14   :  { %2235 = vmatprep.subr.bf16.mxu0 %v2532_v10  ;;  %2255 = vmatprep.subr.bf16.mxu1 %v2551_v28  ;;  %v2579_v55 = vld [vmem:[%s3356_s0 + $0x4c] ss:$12 sps:$4 sm:$0xff]   ;;  %v2090_v59 = vld [vmem:[%s3358_s3] ss:$0 sm:$0xff] }
  0x15   :  { %v2109_v6 = vld [vmem:[%s3359_s6] ss:$0 sm:$0xff]  ;;  %s2688_s6 = smov 64  }
  0x17   :  { %2236 = vmatpush3.bf16.msra.mxu0 %v2533_v12  ;;  %2256 = vmatpush3.bf16.msra.mxu1 %v2553_v30 }
  0x18   :  { %2237 = vmatprep.subr.bf16.mxu0 %v2534_v17  ;;  %2257 = vmatprep.subr.bf16.mxu1 %v2554_v31 }
  0x1b   :  { %2238 = vmatpush3.bf16.msra.mxu0 %v2535_v20  ;;  %2258 = vmatpush3.bf16.msra.mxu1 %v2556_v33 }
  0x1c   :  { %2239 = vmatprep.subr.bf16.mxu0 %v2536_v21  ;;  %2259 = vmatprep.subr.bf16.mxu1 %v2557_v34 }
  0x1f   :  { %2240 = vmatpush3.bf16.msra.mxu0 %v2537_v24  ;;  %2260 = vmatpush3.bf16.msra.mxu1 %v2559_v36 }
  0x20   :  { %2353 = vmatprep.subr.bf16.mxu0 %v2543_v25  ;;  %2261 = vmatprep.subr.bf16.mxu1 %v2560_v38 }
  0x22   :  { %212 = vmatmul.mubr.bf16.vlgmr.msra.gmra.mxu0 %v2091_v27 }
  0x23   :  { %2354 = vmatpush3.bf16.msra.mxu0 %v2543_v25  ;;  %2369 = vmatprep.mubr.bf16.mxu0 %v2567_v39 }
  0x24   :  { %2355 = vmatprep.subr.bf16.mxu0 %v2546_v29  ;;  %2262 = vmatpush3.bf16.msra.mxu1 %v2562_v41 }
  0x25   :  { %2377 = vmatprep.subr.bf16.mxu1 %v2686_v46 }
  0x27   :  { %2356 = vmatpush3.bf16.msra.mxu0 %v2546_v29  ;;  %540 = vmatmul.mubr.bf16.vlgmr.msra.gmra.mxu1 %v2563_v43 }
  0x28   :  { %2357 = vmatprep.subr.bf16.mxu0 %v2549_v32  ;;  %2378 = vmatpush3.bf16.msra.mxu1 %v2875_v44 }
  0x29   :  { %547 = vmatprep.mubr.bf16.mxu1 %v2570_v45  ;;  %2379 = vmatprep.subr.bf16.mxu1 %v2686_v46 }
  0x2b   :  { %2358 = vmatpush3.bf16.msra.mxu0 %v2549_v32 }
  0x2c   :  { %2359 = vmatprep.subr.bf16.mxu0 %v2552_v35  ;;  %2380 = vmatpush3.bf16.msra.mxu1 %v2888_v48 }
  0x2d   :  { %2385 = vmatprep.subr.bf16.mxu1 %v2686_v46 }
  0x2f   :  { %2360 = vmatpush3.bf16.msra.mxu0 %v2552_v35  ;;  %548 = vmatmul.mubr.bf16.gmra.mxu1 %v2572_v50 }
  0x30   :  { %2361 = vmatprep.subr.bf16.mxu0 %v2555_v40  ;;  %555 = vmatprep.mubr.bf16.mxu1 %v2573_v51 }
  0x33   :  { %2362 = vmatpush3.bf16.msra.mxu0 %v2555_v40 }
  0x34   :  { %2363 = vmatprep.subr.bf16.mxu0 %v2558_v42 }
  0x37   :  { %2364 = vmatpush3.bf16.msra.mxu0 %v2558_v42  ;;  %556 = vmatmul.mubr.bf16.gmra.mxu1 %v2575_v54 }
  0x38   :  { %2365 = vmatprep.subr.bf16.mxu0 %v2561_v47  ;;  %563 = vmatprep.mubr.bf16.mxu1 %v2579_v55 }
  0x3b   :  { %2366 = vmatpush3.bf16.msra.mxu0 %v2561_v47 }
  0x3c   :  { %2367 = vmatprep.subr.bf16.mxu0 %v2566_v49 }
  0x3f   :  { %2368 = vmatpush3.bf16.msra.mxu0 %v2566_v49  ;;  %564 = vmatmul.mubr.bf16.gmra.mxu1 %v2581_v57  ;;  %v219_v49 = vlaneseq }
  0x40   :  { %2393 = vmatprep.subr.bf16.mxu0 %v2686_v46  ;;  %2381 = vmatprep.mubr.msk.bf16.mxu1 %vm2687_vm0, %v2686_v46 }
  0x41   :  { %v220_v51 = vand.u32 127, %v219_v49 }
  0x42   :  { %2370 = vmatmul.mubr.bf16.vlgmr.msra.gmra.mxu0 %v2568_v52 }
  0x43   :  { %2373 = vmatprep.mubr.bf16.mxu0 %v2576_v53  ;;  %2394 = vmatpush3.bf16.msra.mxu0 %v2875_v44  ;;  %vm221_vm2 = vcmp.ge.s32.totalorder %v220_v51, 64  ;;  %vm222_vm3 = vcmp.lt.s32.totalorder %v220_v51, 96 }
  0x44   :  { %2395 = vmatprep.subr.bf16.mxu0 %v2686_v46  ;;  %vm2961_vm4 = vmand %vm221_vm2, %vm222_vm3 }
  0x47   :  { %2396 = vmatpush3.bf16.msra.mxu0 %v2888_v48 }
  0x48   :  { %2409 = vmatprep.subr.bf16.mxu0 %v2686_v46 }
  0x4a   :  { %2374 = vmatmul.mubr.bf16.gmra.mxu0 %v2577_v56 }
  0x4b   :  { %2397 = vmatprep.mubr.msk.bf16.mxu0 %vm2687_vm0, %v2686_v46 }
  0xe2   :  { %v2241_v58 = vpop.f32.mrf.mxu0 }
  0xe4   :  { %v2242_v60 = vpop.f32.mrf.mxu0 }
  0xe5   :  { %v2243_v61 = vadd.f32 %v2242_v60, %v2241_v58 }
  0xe6   :  { %v2244_v62 = vpop.f32.mrf.mxu0 }
  0xe7   :  { %v214_v63 = vadd.f32 %v2243_v61, %v2090_v59  ;;  %v2263_v2 = vpop.f32.mrf.mxu1 }
  0xe8   :  { %v2245_v0 = vpop.f32.mrf.mxu0 }
  0xe9   :  { %v2932_v1 = vpack.c.bf16 %v214_v63, %v214_v63  ;;  %v2264_v3 = vpop.f32.mrf.mxu1 }
  0xea   :  { %v2265_v47 = vadd.f32 %v2264_v3, %v2263_v2 }
  0xeb   :  { %2382 = vmatmul.mubr.msk.bf16.vlgmr.msra.gmra.mxu1 %vm650_vm1, %v2932_v1  ;;  %v2266_v4 = vpop.f32.mrf.mxu1 }
  0xec   :  { %2386 = vmatpush3.bf16.msra.mxu1 %v2875_v44  ;;  %2389 = vmatprep.mubr.msk.bf16.mxu1 %vm2687_vm0, %v2686_v46  ;;  %v542_v50 = vadd.f32 %v2265_v47, %v2109_v6 }
  0xed   :  { %2387 = vmatprep.subr.bf16.mxu1 %v2686_v46  ;;  %v2267_v5 = vpop.f32.mrf.mxu1 }
  0xee   :  { %v2268_v7 = vadd.f32 %v2267_v5, %v2266_v4 }
  0xef   :  { %v2269_v8 = vpop.f32.mrf.mxu1 }
  0xf0   :  { %2388 = vmatpush3.bf16.msra.mxu1 %v2888_v48  ;;  %v2945_v9 = vadd.f32 %v2268_v7, %v2109_v6 }
  0xf1   :  { %2401 = vmatprep.subr.bf16.mxu1 %v2686_v46  ;;  %v2270_v10 = vpop.f32.mrf.mxu1 }
  0xf2   :  { %v2271_v11 = vadd.f32 %v2270_v10, %v2269_v8 }
  0xf3   :  { %v2272_v12 = vpop.f32.mrf.mxu1 }
  0xf4   :  { %v550_v13 = vadd.f32 %v2271_v11, %v2109_v6 }
  0xf5   :  { %v2273_v15 = vpop.f32.mrf.mxu1 }
  0xf6   :  { %v2274_v16 = vadd.f32 %v2273_v15, %v2272_v12 }
  0xf7   :  { %v2275_v18 = vpop.f32.mrf.mxu1 }
  0xf8   :  { %v553_v19 = vadd.f32 %v2274_v16, %v2109_v6 }
  0xf9   :  { %v2276_v21 = vpop.f32.mrf.mxu1 }
  0xfa   :  { %v2277_v22 = vadd.f32 %v2276_v21, %v2275_v18 }
  0xfb   :  { %v2278_v24 = vpop.f32.mrf.mxu1 }
  0xfc   :  { %v558_v25 = vadd.f32 %v2277_v22, %v2109_v6 }
  0xfd   :  { %v2279_v27 = vpop.f32.mrf.mxu1 }
  0xfe   :  { %v2280_v28 = vadd.f32 %v2279_v27, %v2278_v24 }
  0xff   :  { %v2281_v30 = vpop.f32.mrf.mxu1 }
 0x100   :  { %v2951_v32 = vadd.f32 %v2280_v28, %v2109_v6 }
 0x101   :  { %v2282_v33 = vpop.f32.mrf.mxu1 }
 0x102   :  { %v2371_v14 = vpop.f32.mrf.mxu0  ;;  %v2283_v34 = vadd.f32 %v2282_v33, %v2281_v30 }
 0x103   :  { %v2284_v35 = vpop.f32.mrf.mxu1  ;;  %v2953_v40 = vadd.f32 %v2371_v14, %v550_v13 }
 0x104   :  { %v606_v17 = vpop.f32.mrf.mxu0  ;;  %v566_v36 = vadd.f32 %v2283_v34, %v2109_v6 }
 0x105   :  { %v2285_v37 = vpop.f32.mrf.mxu1  ;;  %v607_v52 = vadd.f32 %v606_v17, %v542_v50 }
 0x106   :  { %v2372_v20 = vpop.f32.mrf.mxu0  ;;  %v2286_v38 = vadd.f32 %v2285_v37, %v2284_v35 }
 0x107   :  { %v2955_v41 = vadd.f32 %v2372_v20, %v553_v19 }
 0x108   :  { %v2947_v23 = vpop.f32.mrf.mxu0  ;;  %v569_v39 = vadd.f32 %v2286_v38, %v2109_v6 }
 0x109   :  { %v610_v16 = vadd.f32 %v2947_v23, %v2945_v9 }
 0x10a   :  { %v2375_v26 = vpop.f32.mrf.mxu0 }
 0x10b   :  { %v2957_v43 = vadd.f32 %v2375_v26, %v566_v36 }
 0x10c   :  { %v622_v29 = vpop.f32.mrf.mxu0 }
 0x10d   :  { %v2949_v31 = vadd.f32 %v622_v29, %v558_v25 }
 0x10e   :  { %v2376_v42 = vpop.f32.mrf.mxu0 }
 0x10f   :  { %v2959_v45 = vadd.f32 %v2376_v42, %v569_v39 }
 0x110   :  { %v3003_v49 = vpop.f32.mrf.mxu0 }
 0x1ab   :  { %v688_v53 = vpop.f32.mrf.mxu1 }
 0x1ac   :  { %v694_v54 = vadd.f32 %v688_v53, %v607_v52 }
 0x1ad   :  { %v2383_v56 = vpop.f32.mrf.mxu1 }
 0x1ae   :  { %v695_v57 = vadd.f32 %v694_v54, %v694_v54 }
 0x1af   :  { %v691_v58 = vpop.f32.mrf.mxu1 }
 0x1b0   :  { %v696_v59 = vsel %vm2961_vm4, %v695_v57, %v694_v54 }
 0x1b1   :  { %v2149_v60 = vmul.f32 -1.442695, %v696_v59  ;;  %v2384_v61 = vpop.f32.mrf.mxu1 }
 0x1b3   :  { %2590 = vpow2.f32 %v2149_v60 }
 0x1c0   :  { %v2591_v62 = vpop.eup %2590 }
 0x1c1   :  { %v700_v63 = vadd.f32 1.0, %v2591_v62 }
 0x1c3   :  { %2592 = vrcp.f32 %v700_v63 }
 0x1d0   :  { %v2593_v0 = vpop.eup %2592 }
 0x1d1   :  { %v703_v2 = vadd.f32 %v2593_v0, %v2593_v0 }
 0x1d3   :  { %v2150_v3 = vadd.f32 -1.0, %v703_v2 }
 0x1d5   :  { %v705_v4 = vsel %vm2961_vm4, %v2150_v3, %v2593_v0 }
 0x1d6   :  { %708 = vrot.lane.b32.xlu0 %v705_v4, %s2688_s6  ;;  %v706_v7 = vmul.f32 0.0, %v705_v4 }
 0x248   :  { %v709_v5 = vpop.permute.xlu0 %708 }
 0x249   :  { %v711_v6 = vmul.f32 %v709_v5, %v705_v4 }
 0x24b   :  { %713 = vrot.lane.b32.xlu0 %v711_v6, %s2689_s16 }
 0x2bd   :  { %v714_v8 = vpop.permute.xlu0 %713 }
 0x2be   :  { %v716_v10 = vadd.f32 %v714_v8, %v706_v7 }
 0x2c0   :  { %2594 = vtanh.f32 %v716_v10 }
 0x2cd   :  { %v2595_v11 = vpop.eup %2594 }
 0x2ce   :  { %719 = vrot.lane.b32.xlu1 %v2595_v11, %s2688_s6 }
 0x340   :  { %v720_v12 = vpop.permute.xlu1 %719 }
 0x341   :  { %v722_v13 = vmul.f32 %v720_v12, %v705_v4 }
 0x343   :  { %v2972_v14 = vpack.c.bf16 %v722_v13, %v722_v13 }
 0x345   :  { %732 = vrot.lane.b32.xlu1 %v2972_v14, %s2689_s16 }
 0x3b7   :  { %v733_v15 = vpop.permute.xlu1 %732 }
 0x3b8   :  { %2390 = vmatmul.mubr.msk.bf16.vlgmr.msra.gmra.mxu1 %vm650_vm1, %v733_v15 }
 0x3b9   :  { %2402 = vmatpush3.bf16.msra.mxu1 %v2875_v44  ;;  %2405 = vmatprep.mubr.msk.bf16.mxu1 %vm2687_vm0, %v2686_v46 }
 0x3ba   :  { %2403 = vmatprep.subr.bf16.mxu1 %v2686_v46 }
 0x3bd   :  { %2404 = vmatpush3.bf16.msra.mxu1 %v2888_v48 }
 0x3be   :  { %2417 = vmatprep.subr.bf16.mxu1 %v2686_v46 }
 0x478   :  { %v771_v17 = vpop.f32.mrf.mxu1 }
 0x479   :  { %v777_v18 = vadd.f32 %v771_v17, %v610_v16 }
 0x47a   :  { %v2391_v19 = vpop.f32.mrf.mxu1 }
 0x47b   :  { %v778_v20 = vadd.f32 %v777_v18, %v777_v18 }
 0x47c   :  { %v774_v21 = vpop.f32.mrf.mxu1 }
 0x47d   :  { %v779_v22 = vsel %vm2961_vm4, %v778_v20, %v777_v18 }
 0x47e   :  { %v2153_v24 = vmul.f32 -1.442695, %v779_v22  ;;  %v2392_v25 = vpop.f32.mrf.mxu1 }
 0x480   :  { %2596 = vpow2.f32 %v2153_v24 }
 0x48d   :  { %v2597_v26 = vpop.eup %2596 }
 0x48e   :  { %v783_v27 = vadd.f32 1.0, %v2597_v26 }
 0x490   :  { %2598 = vrcp.f32 %v783_v27 }
 0x49d   :  { %v2599_v28 = vpop.eup %2598 }
 0x49e   :  { %v786_v29 = vadd.f32 %v2599_v28, %v2599_v28 }
 0x4a0   :  { %v2154_v30 = vadd.f32 -1.0, %v786_v29 }
 0x4a2   :  { %v788_v9 = vsel %vm2961_vm4, %v2154_v30, %v2599_v28 }
 0x4a3   :  { %791 = vrot.lane.b32.xlu0 %v788_v9, %s2688_s6  ;;  %v789_v34 = vmul.f32 %v788_v9, %v716_v10 }
 0x515   :  { %v792_v23 = vpop.permute.xlu0 %791 }
 0x516   :  { %v794_v33 = vmul.f32 %v792_v23, %v788_v9 }
 0x518   :  { %796 = vrot.lane.b32.xlu1 %v794_v33, %s2689_s16 }
 0x58a   :  { %v797_v35 = vpop.permute.xlu1 %796 }
 0x58b   :  { %v799_v36 = vadd.f32 %v797_v35, %v789_v34 }
 0x58d   :  { %2600 = vtanh.f32 %v799_v36 }
 0x59a   :  { %v2601_v37 = vpop.eup %2600 }
 0x59b   :  { %802 = vrot.lane.b32.xlu0 %v2601_v37, %s2688_s6 }
 0x60d   :  { %v803_v38 = vpop.permute.xlu0 %802 }
 0x60e   :  { %v805_v39 = vmul.f32 %v803_v38, %v788_v9 }
 0x610   :  { %v2992_v42 = vpack.c.bf16 %v805_v39, %v805_v39 }
 0x612   :  { %814 = vrot.lane.b32.xlu1 %v2992_v42, %s2689_s16 }
 0x684   :  { %v815_v47 = vpop.permute.xlu1 %814 }
 0x685   :  { %2398 = vmatmul.mubr.msk.bf16.vlgmr.msra.gmra.mxu0 %vm650_vm1, %v815_v47 }
 0x686   :  { %2410 = vmatpush3.bf16.msra.mxu0 %v2875_v44  ;;  %2413 = vmatprep.mubr.msk.bf16.mxu0 %vm2687_vm0, %v2686_v46 }
 0x687   :  { %2411 = vmatprep.subr.bf16.mxu0 %v2686_v46 }
 0x68a   :  { %2412 = vmatpush3.bf16.msra.mxu0 %v2888_v48 }
 0x68b   :  { %2425 = vmatprep.subr.bf16.mxu0 %v2686_v46 }
 0x745   :  { %v853_v50 = vpop.f32.mrf.mxu0 }
 0x746   :  { %v859_v51 = vadd.f32 %v853_v50, %v2953_v40 }
 0x747   :  { %v2399_v52 = vpop.f32.mrf.mxu0 }
 0x748   :  { %v860_v53 = vadd.f32 %v859_v51, %v859_v51 }
 0x749   :  { %v856_v54 = vpop.f32.mrf.mxu0 }
 0x74a   :  { %v861_v56 = vsel %vm2961_vm4, %v860_v53, %v859_v51 }
 0x74b   :  { %v2157_v57 = vmul.f32 -1.442695, %v861_v56  ;;  %v2400_v58 = vpop.f32.mrf.mxu0 }
 0x74d   :  { %2602 = vpow2.f32 %v2157_v57 }
 0x75a   :  { %v2603_v59 = vpop.eup %2602 }
 0x75b   :  { %v865_v60 = vadd.f32 1.0, %v2603_v59 }
 0x75d   :  { %2604 = vrcp.f32 %v865_v60 }
 0x76a   :  { %v2605_v61 = vpop.eup %2604 }
 0x76b   :  { %v868_v62 = vadd.f32 %v2605_v61, %v2605_v61 }
 0x76d   :  { %v2158_v63 = vadd.f32 -1.0, %v868_v62 }
 0x76f   :  { %v870_v0 = vsel %vm2961_vm4, %v2158_v63, %v2605_v61 }
 0x770   :  { %873 = vrot.lane.b32.xlu0 %v870_v0, %s2688_s6  ;;  %v871_v3 = vmul.f32 %v870_v0, %v799_v36 }
 0x7e2   :  { %v874_v40 = vpop.permute.xlu0 %873 }
 0x7e3   :  { %v876_v2 = vmul.f32 %v874_v40, %v870_v0 }
 0x7e5   :  { %878 = vrot.lane.b32.xlu1 %v876_v2, %s2689_s16 }
 0x857   :  { %v879_v4 = vpop.permute.xlu1 %878 }
 0x858   :  { %v881_v5 = vadd.f32 %v879_v4, %v871_v3 }
 0x85a   :  { %2606 = vtanh.f32 %v881_v5 }
 0x867   :  { %v2607_v6 = vpop.eup %2606 }
 0x868   :  { %884 = vrot.lane.b32.xlu0 %v2607_v6, %s2688_s6  ;;  %v626_v6 = vadd.f32 %v3003_v49, %v2951_v32 }
 0x8da   :  { %v885_v7 = vpop.permute.xlu0 %884 }
 0x8db   :  { %v887_v8 = vmul.f32 %v885_v7, %v870_v0 }
 0x8dd   :  { %v3013_v10 = vpack.c.bf16 %v887_v8, %v887_v8 }
 0x8df   :  { %896 = vrot.lane.b32.xlu1 %v3013_v10, %s2689_s16 }
 0x951   :  { %v897_v11 = vpop.permute.xlu1 %896 }
 0x952   :  { %2406 = vmatmul.mubr.msk.bf16.vlgmr.msra.gmra.mxu1 %vm650_vm1, %v897_v11 }
 0x953   :  { %2418 = vmatpush3.bf16.msra.mxu1 %v2875_v44  ;;  %2421 = vmatprep.mubr.msk.bf16.mxu1 %vm2687_vm0, %v2686_v46 }
 0x954   :  { %2419 = vmatprep.subr.bf16.mxu1 %v2686_v46 }
 0x957   :  { %2420 = vmatpush3.bf16.msra.mxu1 %v2888_v48 }
 0x958   :  { %2433 = vmatprep.subr.bf16.mxu1 %v2686_v46 }
 0xa12   :  { %v935_v12 = vpop.f32.mrf.mxu1 }
 0xa13   :  { %v941_v13 = vadd.f32 %v935_v12, %v2955_v41 }
 0xa14   :  { %v2407_v15 = vpop.f32.mrf.mxu1 }
 0xa15   :  { %v942_v16 = vadd.f32 %v941_v13, %v941_v13 }
 0xa16   :  { %v938_v17 = vpop.f32.mrf.mxu1 }
 0xa17   :  { %v943_v18 = vsel %vm2961_vm4, %v942_v16, %v941_v13 }
 0xa18   :  { %v2161_v19 = vmul.f32 -1.442695, %v943_v18  ;;  %v2408_v20 = vpop.f32.mrf.mxu1 }
 0xa1a   :  { %2608 = vpow2.f32 %v2161_v19 }
 0xa27   :  { %v2609_v21 = vpop.eup %2608 }
 0xa28   :  { %v947_v22 = vadd.f32 1.0, %v2609_v21 }
 0xa2a   :  { %2610 = vrcp.f32 %v947_v22 }
 0xa37   :  { %v2611_v24 = vpop.eup %2610 }
 0xa38   :  { %v950_v25 = vadd.f32 %v2611_v24, %v2611_v24 }
 0xa3a   :  { %v2162_v26 = vadd.f32 -1.0, %v950_v25 }
 0xa3c   :  { %v952_v27 = vsel %vm2961_vm4, %v2162_v26, %v2611_v24 }
 0xa3d   :  { %955 = vrot.lane.b32.xlu0 %v952_v27, %s2688_s6  ;;  %v953_v29 = vmul.f32 %v952_v27, %v881_v5 }
 0xaaf   :  { %v956_v41 = vpop.permute.xlu0 %955 }
 0xab0   :  { %v958_v28 = vmul.f32 %v956_v41, %v952_v27 }
 0xab2   :  { %960 = vrot.lane.b32.xlu1 %v958_v28, %s2689_s16 }
 0xb24   :  { %v961_v30 = vpop.permute.xlu1 %960 }
 0xb25   :  { %v963_v9 = vadd.f32 %v961_v30, %v953_v29 }
 0xb27   :  { %2612 = vtanh.f32 %v963_v9 }
 0xb34   :  { %v2613_v23 = vpop.eup %2612 }
 0xb35   :  { %966 = vrot.lane.b32.xlu0 %v2613_v23, %s2688_s6 }
 0xba7   :  { %v967_v33 = vpop.permute.xlu0 %966 }
 0xba8   :  { %v969_v34 = vmul.f32 %v967_v33, %v952_v27 }
 0xbaa   :  { %v3032_v35 = vpack.c.bf16 %v969_v34, %v969_v34 }
 0xbac   :  { %978 = vrot.lane.b32.xlu1 %v3032_v35, %s2689_s16 }
 0xc1e   :  { %v979_v36 = vpop.permute.xlu1 %978 }
 0xc1f   :  { %2414 = vmatmul.mubr.msk.bf16.vlgmr.msra.gmra.mxu0 %vm650_vm1, %v979_v36 }
 0xc20   :  { %2426 = vmatpush3.bf16.msra.mxu0 %v2875_v44  ;;  %2429 = vmatprep.mubr.msk.bf16.mxu0 %vm2687_vm0, %v2686_v46 }
 0xc21   :  { %2427 = vmatprep.subr.bf16.mxu0 %v2686_v46 }
 0xc24   :  { %2428 = vmatpush3.bf16.msra.mxu0 %v2888_v48 }
 0xcdf   :  { %v1017_v37 = vpop.f32.mrf.mxu0 }
 0xce0   :  { %v1023_v38 = vadd.f32 %v1017_v37, %v2949_v31 }
 0xce1   :  { %v2415_v39 = vpop.f32.mrf.mxu0 }
 0xce2   :  { %v1024_v47 = vadd.f32 %v1023_v38, %v1023_v38 }
 0xce3   :  { %v1020_v50 = vpop.f32.mrf.mxu0 }
 0xce4   :  { %v1025_v51 = vsel %vm2961_vm4, %v1024_v47, %v1023_v38 }
 0xce5   :  { %v2165_v52 = vmul.f32 -1.442695, %v1025_v51  ;;  %v2416_v53 = vpop.f32.mrf.mxu0 }
 0xce7   :  { %2614 = vpow2.f32 %v2165_v52 }
 0xcf4   :  { %v2615_v54 = vpop.eup %2614 }
 0xcf5   :  { %v1029_v56 = vadd.f32 1.0, %v2615_v54 }
 0xcf7   :  { %2616 = vrcp.f32 %v1029_v56 }
 0xd04   :  { %v2617_v57 = vpop.eup %2616 }
 0xd05   :  { %v1032_v58 = vadd.f32 %v2617_v57, %v2617_v57 }
 0xd07   :  { %v2166_v59 = vadd.f32 -1.0, %v1032_v58 }
 0xd09   :  { %v1034_v60 = vsel %vm2961_vm4, %v2166_v59, %v2617_v57 }
 0xd0a   :  { %1037 = vrot.lane.b32.xlu0 %v1034_v60, %s2688_s6  ;;  %v1035_v62 = vmul.f32 %v1034_v60, %v963_v9 }
 0xd7c   :  { %v1038_v31 = vpop.permute.xlu0 %1037 }
 0xd7d   :  { %v1040_v61 = vmul.f32 %v1038_v31, %v1034_v60 }
 0xd7f   :  { %1042 = vrot.lane.b32.xlu1 %v1040_v61, %s2689_s16 }
 0xdf1   :  { %v1043_v63 = vpop.permute.xlu1 %1042 }
 0xdf2   :  { %v1045_v0 = vadd.f32 %v1043_v63, %v1035_v62 }
 0xdf4   :  { %2618 = vtanh.f32 %v1045_v0 }
 0xe01   :  { %v2619_v40 = vpop.eup %2618 }
 0xe02   :  { %1048 = vrot.lane.b32.xlu0 %v2619_v40, %s2688_s6 }
 0xe74   :  { %v1049_v2 = vpop.permute.xlu0 %1048 }
 0xe75   :  { %v1051_v3 = vmul.f32 %v1049_v2, %v1034_v60 }
 0xe77   :  { %v3050_v4 = vpack.c.bf16 %v1051_v3, %v1051_v3  ;;  %v3121_v3 = vld [vmem:[%s3361_s8] sm:$0xff]  }
 0xe79   :  { %1060 = vrot.lane.b32.xlu1 %v3050_v4, %s2689_s16 }
 0xeeb   :  { %v1061_v5 = vpop.permute.xlu1 %1060 }
 0xeec   :  { %2422 = vmatmul.mubr.msk.bf16.vlgmr.msra.gmra.mxu1 %vm650_vm1, %v1061_v5 }
 0xeed   :  { %2434 = vmatpush3.bf16.msra.mxu1 %v2875_v44  ;;  %2437 = vmatprep.mubr.msk.bf16.mxu1 %vm2687_vm0, %v2686_v46 }
 0xeee   :  { %2435 = vmatprep.subr.bf16.mxu1 %v2686_v46 }
 0xef1   :  { %2436 = vmatpush3.bf16.msra.mxu1 %v2888_v48 }
 0xef2   :  { %2453 = vmatprep.subr.bf16.mxu1 %v2686_v46 }
 0xfac   :  { %v1099_v7 = vpop.f32.mrf.mxu1 }
 0xfad   :  { %v1105_v8 = vadd.f32 %v1099_v7, %v626_v6 }
 0xfae   :  { %v2423_v11 = vpop.f32.mrf.mxu1 }
 0xfaf   :  { %v1106_v12 = vadd.f32 %v1105_v8, %v1105_v8 }
 0xfb0   :  { %v1102_v13 = vpop.f32.mrf.mxu1 }
 0xfb1   :  { %v1107_v44 = vsel %vm2961_vm4, %v1106_v12, %v1105_v8 }
 0xfb2   :  { %v2169_v15 = vmul.f32 -1.442695, %v1107_v44  ;;  %v2424_v16 = vpop.f32.mrf.mxu1 }
 0xfb4   :  { %2620 = vpow2.f32 %v2169_v15 }
 0xfc1   :  { %v2621_v17 = vpop.eup %2620 }
 0xfc2   :  { %v1111_v18 = vadd.f32 1.0, %v2621_v17 }
 0xfc4   :  { %2622 = vrcp.f32 %v1111_v18 }
 0xfd1   :  { %v2623_v48 = vpop.eup %2622 }
 0xfd2   :  { %v1114_v19 = vadd.f32 %v2623_v48, %v2623_v48 }
 0xfd4   :  { %v2170_v20 = vadd.f32 -1.0, %v1114_v19 }
 0xfd6   :  { %v1116_v32 = vsel %vm2961_vm4, %v2170_v20, %v2623_v48 }
 0xfd7   :  { %1119 = vrot.lane.b32.xlu0 %v1116_v32, %s2688_s6  ;;  %v1117_v22 = vmul.f32 %v1116_v32, %v1045_v0 }
0x1049   :  { %v1120_v49 = vpop.permute.xlu0 %1119 }
0x104a   :  { %v1122_v21 = vmul.f32 %v1120_v49, %v1116_v32 }
0x104c   :  { %1124 = vrot.lane.b32.xlu1 %v1122_v21, %s2689_s16 }
0x10be   :  { %v1125_v24 = vpop.permute.xlu1 %1124 }
0x10bf   :  { %v1127_v25 = vadd.f32 %v1125_v24, %v1117_v22 }
0x10c1   :  { %2624 = vtanh.f32 %v1127_v25 }
0x10ce   :  { %v2625_v26 = vpop.eup %2624 }
0x10cf   :  { %1130 = vrot.lane.b32.xlu0 %v2625_v26, %s2688_s6 }
0x1141   :  { %v1131_v27 = vpop.permute.xlu0 %1130 }
0x1142   :  { %v1133_v41 = vmul.f32 %v1131_v27, %v1116_v32 }
0x1144   :  { %v3070_v28 = vpack.c.bf16 %v1133_v41, %v1133_v41 }
0x1146   :  { %1142 = vrot.lane.b32.xlu1 %v3070_v28, %s2689_s16 }
0x11b8   :  { %v1143_v29 = vpop.permute.xlu1 %1142 }
0x11b9   :  { %2430 = vmatmul.mubr.msk.bf16.vlgmr.msra.gmra.mxu0 %vm650_vm1, %v1143_v29 }
0x1279   :  { %v1181_v30 = vpop.f32.mrf.mxu0 }
0x127a   :  { %v1187_v9 = vadd.f32 %v1181_v30, %v2957_v43 }
0x127b   :  { %v2431_v23 = vpop.f32.mrf.mxu0 }
0x127c   :  { %v1188_v33 = vadd.f32 %v1187_v9, %v1187_v9 }
0x127d   :  { %v1184_v34 = vpop.f32.mrf.mxu0 }
0x127e   :  { %v1189_v36 = vsel %vm2961_vm4, %v1188_v33, %v1187_v9 }
0x127f   :  { %v2173_v37 = vmul.f32 -1.442695, %v1189_v36  ;;  %v2432_v38 = vpop.f32.mrf.mxu0 }
0x1281   :  { %2626 = vpow2.f32 %v2173_v37 }
0x128e   :  { %v2627_v39 = vpop.eup %2626 }
0x128f   :  { %v1193_v47 = vadd.f32 1.0, %v2627_v39 }
0x1291   :  { %2628 = vrcp.f32 %v1193_v47 }
0x129e   :  { %v2629_v50 = vpop.eup %2628 }
0x129f   :  { %v1196_v51 = vadd.f32 %v2629_v50, %v2629_v50 }
0x12a1   :  { %v2174_v52 = vadd.f32 -1.0, %v1196_v51 }
0x12a3   :  { %v1198_v53 = vsel %vm2961_vm4, %v2174_v52, %v2629_v50 }
0x12a4   :  { %1201 = vrot.lane.b32.xlu0 %v1198_v53, %s2688_s6  ;;  %v1199_v56 = vmul.f32 %v1198_v53, %v1127_v25 }
0x1316   :  { %v1202_v43 = vpop.permute.xlu0 %1201 }
0x1317   :  { %v1204_v54 = vmul.f32 %v1202_v43, %v1198_v53 }
0x1319   :  { %1206 = vrot.lane.b32.xlu1 %v1204_v54, %s2689_s16 }
0x131d   :  { %727 = vrot.lane.b32.xlu1 %v2972_v14, %s2689_s16  ;;  %v2582_v14 = vld [vmem:[%s3360_s7 + $0x8] sm:$0xff]  }
0x131e   :  { %2441 = vmatprep.subr.bf16.mxu0 %v2582_v14 }
0x131f   :  { %2442 = vmatpush3.bf16.msra.mxu0 %v2582_v14 }
0x1321   :  { %892 = vrot.lane.b32.xlu1 %v3013_v10, %s2689_s16  ;;  %v2583_v10 = vld [vmem:[%s3360_s7] sm:$0xff]  }
0x1322   :  { %2443 = vmatprep.subr.bf16.mxu0 %v2583_v10 }
0x1323   :  { %2444 = vmatpush3.bf16.msra.mxu0 %v2583_v10 }
0x1324   :  { %2469 = vmatprep.subr.bf16.mxu0 %v2686_v46 }
0x138b   :  { %v1207_v57 = vpop.permute.xlu1 %1206 }
0x138c   :  { %v3086_v58 = vadd.f32 %v1207_v57, %v1199_v56 }
0x138e   :  { %2630 = vtanh.f32 %v3086_v58 }
0x138f   :  { %v728_v59 = vpop.permute.xlu1 %727 }
0x1390   :  { %731 = vst.msk [vmem:[#allocation2] sm:$0xf] %vm730_vm5, %v728_v59 }
0x1393   :  { %v893_v60 = vpop.permute.xlu1 %892 }
0x1394   :  { %895 = vst.msk [vmem:[#allocation2 + $0x8] sm:$0xf] %vm730_vm5, %v893_v60 }
0x139b   :  { %v2631_v31 = vpop.eup %2630 }
0x139c   :  { %1212 = vrot.lane.b32.xlu0 %v2631_v31, %s2688_s6 }
0x13a0   :  { %810 = vrot.lane.b32.xlu0 %v2992_v42, %s2689_s16 }
0x13a4   :  { %974 = vrot.lane.b32.xlu0 %v3032_v35, %s2689_s16  ;;  %v3113_v35 = vld [vmem:[%s3361_s8 + $0x8] sm:$0xff]  }
0x140e   :  { %v1213_v61 = vpop.permute.xlu0 %1212 }
0x140f   :  { %v1215_v62 = vmul.f32 %v1213_v61, %v1198_v53 }
0x1411   :  { %v3103_v63 = vpack.c.bf16 %v1215_v62, %v1215_v62 }
0x1412   :  { %v811_v0 = vpop.permute.xlu0 %810 }
0x1413   :  { %813 = vst.msk [vmem:[#allocation2 + $0x4] sm:$0xf] %vm730_vm5, %v811_v0  ;;  %1224 = vrot.lane.b32.xlu1 %v3103_v63, %s2689_s16 }
0x1416   :  { %v975_v40 = vpop.permute.xlu0 %974 }
0x1417   :  { %977 = vst.msk [vmem:[#allocation2 + $0xc] sm:$0xf] %vm730_vm5, %v975_v40 }
0x141a   :  { %v2584_v2 = vld [vmem:[#allocation2] sm:$0xff]  }
0x141b   :  { %2445 = vmatprep.mubr.msk.bf16.mxu0 %vm650_vm1, %v2584_v2 }
0x141e   :  { %v2585_v42 = vld [vmem:[#allocation2 + $0x8] sm:$0xff]  }
0x141f   :  { %2446 = vmatmul.mubr.msk.bf16.vlgmr.msra.gmra.mxu0 %vm650_vm1, %v2585_v42 }
0x1420   :  { %2470 = vmatpush3.bf16.msra.mxu0 %v3113_v35 }
0x1421   :  { %2471 = vmatprep.subr.bf16.mxu0 %v2686_v46 }
0x1424   :  { %2472 = vmatpush3.bf16.msra.mxu0 %v3121_v3 }
0x1425   :  { %2485 = vmatprep.subr.bf16.mxu0 %v2686_v46 }
0x1485   :  { %v1225_v5 = vpop.permute.xlu1 %1224 }
0x1486   :  { %2438 = vmatmul.mubr.msk.bf16.vlgmr.msra.gmra.mxu1 %vm650_vm1, %v1225_v5 }
0x1487   :  { %2454 = vmatpush3.bf16.msra.mxu1 %v3113_v35  ;;  %2457 = vmatprep.mubr.msk.bf16.mxu1 %vm2687_vm0, %v2686_v46 }
0x1488   :  { %2455 = vmatprep.subr.bf16.mxu1 %v2686_v46 }
0x148b   :  { %2456 = vmatpush3.bf16.msra.mxu1 %v3121_v3 }
0x148c   :  { %2461 = vmatprep.subr.bf16.mxu1 %v2686_v46 }
0x148e   :  { %2458 = vmatmul.mubr.msk.bf16.vlgmr.msra.gmra.mxu1 %vm650_vm1, %v2932_v1  ;;  %v3146_v1 = vld [vmem:[%s3362_s9] ss:$0 sm:$0xff] }
0x148f   :  { %2462 = vmatpush3.bf16.msra.mxu1 %v3113_v35  ;;  %2465 = vmatprep.mubr.msk.bf16.mxu1 %vm2687_vm0, %v2686_v46 }
0x1490   :  { %2463 = vmatprep.subr.bf16.mxu1 %v2686_v46 }
0x1493   :  { %2464 = vmatpush3.bf16.msra.mxu1 %v3121_v3 }
0x1494   :  { %2477 = vmatprep.subr.bf16.mxu1 %v2686_v46 }
0x14df   :  { %v3140_v6 = vpop.f32.mrf.mxu0 }
0x14e1   :  { %v1407_v12 = vpop.f32.mrf.mxu0 }
0x14e2   :  { %v1408_v15 = vadd.f32 %v3146_v1, %v1407_v12 }
0x14e3   :  { %v3182_v62 = vpop.f32.mrf.mxu0 }
0x14e5   :  { %v1410_v0 = vpop.f32.mrf.mxu0 }
0x14e6   :  { %v1411_v40 = vadd.f32 %v3146_v1, %v1410_v0 }
0x1546   :  { %v1263_v7 = vpop.f32.mrf.mxu1 }
0x1547   :  { %v1269_v8 = vadd.f32 %v1263_v7, %v2959_v45 }
0x1548   :  { %v2439_v11 = vpop.f32.mrf.mxu1 }
0x1549   :  { %v1270_v29 = vadd.f32 %v1269_v8, %v1269_v8 }
0x154a   :  { %v1266_v13 = vpop.f32.mrf.mxu1 }
0x154b   :  { %v1271_v30 = vsel %vm2961_vm4, %v1270_v29, %v1269_v8 }
0x154c   :  { %v2440_v44 = vpop.f32.mrf.mxu1  ;;  %v2177_v9 = vmul.f32 -1.442695, %v1271_v30 }
0x154e   :  { %v1484_v16 = vpop.f32.mrf.mxu1 }
0x154f   :  { %v1490_v17 = vadd.f32 %v1484_v16, %v1408_v15 }
0x1550   :  { %v2459_v18 = vpop.f32.mrf.mxu1 }
0x1551   :  { %v1491_v48 = vadd.f32 %v1490_v17, %v1490_v17 }
0x1552   :  { %v1487_v19 = vpop.f32.mrf.mxu1 }
0x1553   :  { %v1492_v20 = vsel %vm2961_vm4, %v1491_v48, %v1490_v17 }
0x1554   :  { %v2194_v45 = vmul.f32 -1.442695, %v1492_v20  ;;  %v2460_v32 = vpop.f32.mrf.mxu1 }
0x1556   :  { %2632 = vpow2.f32 %v2194_v45 }
0x1563   :  { %v2633_v49 = vpop.eup %2632 }
0x1564   :  { %v1496_v21 = vadd.f32 1.0, %v2633_v49 }
0x1566   :  { %2634 = vrcp.f32 %v1496_v21 }
0x1567   :  { %2636 = vpow2.f32 %v2177_v9 }
0x1573   :  { %v2635_v22 = vpop.eup %2634 }
0x1574   :  { %v1499_v24 = vadd.f32 %v2635_v22, %v2635_v22  ;;  %v2637_v23 = vpop.eup %2636 }
0x1575   :  { %v1275_v33 = vadd.f32 1.0, %v2637_v23 }
0x1576   :  { %v2195_v25 = vadd.f32 -1.0, %v1499_v24 }
0x1577   :  { %2638 = vrcp.f32 %v1275_v33 }
0x1578   :  { %v1501_v26 = vsel %vm2961_vm4, %v2195_v25, %v2635_v22 }
0x1579   :  { %1504 = vrot.lane.b32.xlu0 %v1501_v26, %s2688_s6  ;;  %v1502_v34 = vmul.f32 0.0, %v1501_v26 }
0x1584   :  { %v2639_v38 = vpop.eup %2638 }
0x1585   :  { %v1278_v39 = vadd.f32 %v2639_v38, %v2639_v38 }
0x1587   :  { %v2178_v50 = vadd.f32 -1.0, %v1278_v39 }
0x1589   :  { %v1280_v51 = vsel %vm2961_vm4, %v2178_v50, %v2639_v38 }
0x158a   :  { %v1281_v59 = vmul.f32 %v1280_v51, %v3086_v58 }
0x15eb   :  { %v1505_v27 = vpop.permute.xlu0 %1504 }
0x15ec   :  { %v1507_v41 = vmul.f32 %v1505_v27, %v1501_v26 }
0x15ee   :  { %1509 = vrot.lane.b32.xlu1 %v1507_v41, %s2689_s16 }
0x1660   :  { %v1510_v36 = vpop.permute.xlu1 %1509 }
0x1661   :  { %v1512_v37 = vadd.f32 %v1510_v36, %v1502_v34  ;;  %v1416_v34 = vadd.f32 %v3140_v6, %v3146_v1 }
0x1663   :  { %2640 = vtanh.f32 %v1512_v37 }
0x1670   :  { %v2641_v47 = vpop.eup %2640 }
0x1671   :  { %1515 = vrot.lane.b32.xlu0 %v2641_v47, %s2688_s6 }
0x1675   :  { %1283 = vrot.lane.b32.xlu0 %v1280_v51, %s2688_s6 }
0x16e3   :  { %v1516_v52 = vpop.permute.xlu0 %1515 }
0x16e4   :  { %v3161_v53 = vmul.f32 %v1516_v52, %v1501_v26 }
0x16e6   :  { %v1524_v43 = vpack.c.bf16 %v3161_v53, %v3161_v53 }
0x16e7   :  { %v1284_v54 = vpop.permute.xlu0 %1283 }
0x16e8   :  { %v1286_v56 = vmul.f32 %v1284_v54, %v1280_v51  ;;  %1526 = vrot.lane.b32.xlu1 %v1524_v43, %s2689_s16 }
0x16ea   :  { %1288 = vrot.lane.b32.xlu0 %v1286_v56, %s2689_s16 }
0x175a   :  { %v1527_v57 = vpop.permute.xlu1 %1526 }
0x175b   :  { %2466 = vmatmul.mubr.msk.bf16.vlgmr.msra.gmra.mxu1 %vm650_vm1, %v1527_v57 }
0x175c   :  { %v1289_v60 = vpop.permute.xlu0 %1288  ;;  %2478 = vmatpush3.bf16.msra.mxu1 %v3113_v35  ;;  %2481 = vmatprep.mubr.msk.bf16.mxu1 %vm2687_vm0, %v2686_v46 }
0x175d   :  { %v1291_v14 = vadd.f32 %v1289_v60, %v1281_v59  ;;  %2479 = vmatprep.subr.bf16.mxu1 %v2686_v46 }
0x175f   :  { %2642 = vtanh.f32 %v1291_v14 }
0x1760   :  { %2480 = vmatpush3.bf16.msra.mxu1 %v3121_v3 }
0x1761   :  { %2493 = vmatprep.subr.bf16.mxu1 %v2686_v46 }
0x176c   :  { %v2643_v10 = vpop.eup %2642 }
0x176d   :  { %1294 = vrot.lane.b32.xlu0 %v2643_v10, %s2688_s6 }
0x1771   :  { %1056 = vrot.lane.b32.xlu0 %v3050_v4, %s2689_s16 }
0x1775   :  { %1220 = vrot.lane.b32.xlu0 %v3103_v63, %s2689_s16 }
0x17df   :  { %v1295_v58 = vpop.permute.xlu0 %1294 }
0x17e0   :  { %v1297_v49 = vmul.f32 %v1295_v58, %v1280_v51 }
0x17e2   :  { %v2224_v21 = vpack.c.bf16 %v1297_v49, %v1297_v49 }
0x17e3   :  { %v1057_v31 = vpop.permute.xlu0 %1056 }
0x17e4   :  { %1059 = vst.msk [vmem:[#allocation2 + $0x10] sm:$0xf] %vm730_vm5, %v1057_v31 }
0x17e7   :  { %v1221_v61 = vpop.permute.xlu0 %1220 }
0x17e8   :  { %1223 = vst.msk [vmem:[#allocation2 + $0x18] sm:$0xf] %vm730_vm5, %v1221_v61 }
0x181b   :  { %v1565_v2 = vpop.f32.mrf.mxu1 }
0x181c   :  { %v1571_v42 = vadd.f32 %v1565_v2, %v1411_v40 }
0x181d   :  { %v2467_v5 = vpop.f32.mrf.mxu1 }
0x181e   :  { %v1572_v7 = vadd.f32 %v1571_v42, %v1571_v42  ;;  %v1419_v5 = vadd.f32 %v3182_v62, %v3146_v1 }
0x181f   :  { %v1568_v4 = vpop.f32.mrf.mxu1 }
0x1820   :  { %v1573_v63 = vsel %vm2961_vm4, %v1572_v7, %v1571_v42 }
0x1821   :  { %v2197_v8 = vmul.f32 -1.442695, %v1573_v63  ;;  %v2468_v11 = vpop.f32.mrf.mxu1 }
0x1823   :  { %2644 = vpow2.f32 %v2197_v8 }
0x1830   :  { %v2645_v12 = vpop.eup %2644 }
0x1831   :  { %v1577_v13 = vadd.f32 1.0, %v2645_v12 }
0x1833   :  { %2646 = vrcp.f32 %v1577_v13 }
0x1840   :  { %v2647_v44 = vpop.eup %2646 }
0x1841   :  { %v1580_v15 = vadd.f32 %v2647_v44, %v2647_v44 }
0x1843   :  { %v2198_v16 = vadd.f32 -1.0, %v1580_v15 }
0x1845   :  { %v1582_v17 = vsel %vm2961_vm4, %v2198_v16, %v2647_v44 }
0x1846   :  { %1585 = vrot.lane.b32.xlu1 %v1582_v17, %s2688_s6  ;;  %v1583_v19 = vmul.f32 %v1582_v17, %v1512_v37 }
0x18b8   :  { %v1586_v18 = vpop.permute.xlu1 %1585 }
0x18b9   :  { %v1588_v48 = vmul.f32 %v1586_v18, %v1582_v17 }
0x18bb   :  { %1590 = vrot.lane.b32.xlu1 %v1588_v48, %s2689_s16 }
0x192d   :  { %v1591_v20 = vpop.permute.xlu1 %1590 }
0x192e   :  { %v1593_v45 = vadd.f32 %v1591_v20, %v1583_v19 }
0x1930   :  { %2648 = vtanh.f32 %v1593_v45 }
0x193d   :  { %v2649_v32 = vpop.eup %2648 }
0x193e   :  { %1596 = vrot.lane.b32.xlu1 %v2649_v32, %s2688_s6 }
0x1942   :  { %1138 = vrot.lane.b32.xlu1 %v3070_v28, %s2689_s16 }
0x1946   :  { %1302 = vrot.lane.b32.xlu1 %v2224_v21, %s2689_s16 }
0x19b0   :  { %v1597_v22 = vpop.permute.xlu1 %1596 }
0x19b1   :  { %v3195_v24 = vmul.f32 %v1597_v22, %v1582_v17 }
0x19b3   :  { %v1606_v25 = vpack.c.bf16 %v3195_v24, %v3195_v24 }
0x19b4   :  { %v1139_v26 = vpop.permute.xlu1 %1138 }
0x19b5   :  { %1141 = vst.msk [vmem:[#allocation2 + $0x14] sm:$0xf] %vm730_vm5, %v1139_v26  ;;  %1608 = vrot.lane.b32.xlu0 %v1606_v25, %s2689_s16 }
0x19b8   :  { %v1303_v27 = vpop.permute.xlu1 %1302 }
0x19b9   :  { %1305 = vst.msk [vmem:[#allocation2 + $0x1c] sm:$0xf] %vm730_vm5, %v1303_v27 }
0x19bc   :  { %v2588_v41 = vld [vmem:[#allocation2 + $0x10] sm:$0xff]  }
0x19bd   :  { %2449 = vmatprep.mubr.msk.bf16.mxu0 %vm650_vm1, %v2588_v41 }
0x19c0   :  { %v2589_v28 = vld [vmem:[#allocation2 + $0x18] sm:$0xff]  }
0x19c1   :  { %2450 = vmatmul.mubr.msk.bf16.gmra.mxu0 %vm650_vm1, %v2589_v28 }
0x19c2   :  { %2473 = vmatprep.mubr.msk.bf16.mxu0 %vm2687_vm0, %v2686_v46 }
0x1a27   :  { %v1609_v29 = vpop.permute.xlu0 %1608 }
0x1a28   :  { %2474 = vmatmul.mubr.msk.bf16.vlgmr.msra.gmra.mxu0 %vm650_vm1, %v1609_v29 }
0x1a29   :  { %2486 = vmatpush3.bf16.msra.mxu0 %v3113_v35  ;;  %2489 = vmatprep.mubr.msk.bf16.mxu0 %vm2687_vm0, %v2686_v46 }
0x1a2a   :  { %2487 = vmatprep.subr.bf16.mxu0 %v2686_v46 }
0x1a2d   :  { %2488 = vmatpush3.bf16.msra.mxu0 %v3121_v3 }
0x1a2e   :  { %2501 = vmatprep.subr.bf16.mxu0 %v2686_v46 }
0x1a81   :  { %v3213_v30 = vpop.f32.mrf.mxu0 }
0x1a83   :  { %v3215_v9 = vpop.f32.mrf.mxu0 }
0x1a84   :  { %v1424_v41 = vadd.f32 %v3146_v1, %v3215_v9 }
0x1a85   :  { %v3217_v23 = vpop.f32.mrf.mxu0 }
0x1a87   :  { %v3219_v33 = vpop.f32.mrf.mxu0 }
0x1ae8   :  { %v1647_v36 = vpop.f32.mrf.mxu0 }
0x1ae9   :  { %v1653_v37 = vadd.f32 %v1647_v36, %v1416_v34 }
0x1aea   :  { %v2475_v38 = vpop.f32.mrf.mxu0 }
0x1aeb   :  { %v1654_v39 = vadd.f32 %v1653_v37, %v1653_v37 }
0x1aec   :  { %v1650_v47 = vpop.f32.mrf.mxu0 }
0x1aed   :  { %v1655_v50 = vsel %vm2961_vm4, %v1654_v39, %v1653_v37 }
0x1aee   :  { %v2200_v51 = vmul.f32 -1.442695, %v1655_v50  ;;  %v2476_v52 = vpop.f32.mrf.mxu0 }
0x1af0   :  { %2650 = vpow2.f32 %v2200_v51 }
0x1afd   :  { %v2651_v43 = vpop.eup %2650 }
0x1afe   :  { %v1659_v54 = vadd.f32 1.0, %v2651_v43 }
0x1b00   :  { %2652 = vrcp.f32 %v1659_v54 }
0x1b0d   :  { %v2653_v56 = vpop.eup %2652 }
0x1b0e   :  { %v1662_v57 = vadd.f32 %v2653_v56, %v2653_v56 }
0x1b10   :  { %v2201_v59 = vadd.f32 -1.0, %v1662_v57 }
0x1b12   :  { %v1664_v6 = vsel %vm2961_vm4, %v2201_v59, %v2653_v56 }
0x1b13   :  { %1667 = vrot.lane.b32.xlu1 %v1664_v6, %s2688_s6  ;;  %v1665_v10 = vmul.f32 %v1664_v6, %v1593_v45 }
0x1b85   :  { %v1668_v60 = vpop.permute.xlu1 %1667 }
0x1b86   :  { %v1670_v14 = vmul.f32 %v1668_v60, %v1664_v6 }
0x1b88   :  { %1672 = vrot.lane.b32.xlu0 %v1670_v14, %s2689_s16 }
0x1bfa   :  { %v1673_v58 = vpop.permute.xlu0 %1672 }
0x1bfb   :  { %v1675_v31 = vadd.f32 %v1673_v58, %v1665_v10 }
0x1bfd   :  { %2654 = vtanh.f32 %v1675_v31 }
0x1c0a   :  { %v2655_v61 = vpop.eup %2654 }
0x1c0b   :  { %1678 = vrot.lane.b32.xlu1 %v2655_v61, %s2688_s6 }
0x1c7d   :  { %v1679_v0 = vpop.permute.xlu1 %1678 }
0x1c7e   :  { %v3230_v40 = vmul.f32 %v1679_v0, %v1664_v6  ;;  %v1427_v0 = vadd.f32 %v3146_v1, %v3219_v33 }
0x1c80   :  { %v1688_v2 = vpack.c.bf16 %v3230_v40, %v3230_v40 }
0x1c82   :  { %1690 = vrot.lane.b32.xlu0 %v1688_v2, %s2689_s16 }
0x1cf4   :  { %v1691_v42 = vpop.permute.xlu0 %1690 }
0x1cf5   :  { %2482 = vmatmul.mubr.msk.bf16.vlgmr.msra.gmra.mxu1 %vm650_vm1, %v1691_v42 }
0x1cf6   :  { %2494 = vmatpush3.bf16.msra.mxu1 %v3113_v35  ;;  %2497 = vmatprep.mubr.msk.bf16.mxu1 %vm2687_vm0, %v2686_v46 }
0x1cf7   :  { %2495 = vmatprep.subr.bf16.mxu1 %v2686_v46 }
0x1cfa   :  { %2496 = vmatpush3.bf16.msra.mxu1 %v3121_v3 }
0x1cfb   :  { %2509 = vmatprep.subr.bf16.mxu1 %v2686_v46 }
0x1db5   :  { %v1729_v7 = vpop.f32.mrf.mxu1 }
0x1db6   :  { %v1735_v4 = vadd.f32 %v1729_v7, %v1419_v5 }
0x1db7   :  { %v2483_v63 = vpop.f32.mrf.mxu1 }
0x1db8   :  { %v1736_v8 = vadd.f32 %v1735_v4, %v1735_v4 }
0x1db9   :  { %v1732_v11 = vpop.f32.mrf.mxu1 }
0x1dba   :  { %v1737_v12 = vsel %vm2961_vm4, %v1736_v8, %v1735_v4 }
0x1dbb   :  { %v2203_v13 = vmul.f32 -1.442695, %v1737_v12  ;;  %v2484_v44 = vpop.f32.mrf.mxu1 }
0x1dbd   :  { %2656 = vpow2.f32 %v2203_v13 }
0x1dca   :  { %v2657_v15 = vpop.eup %2656 }
0x1dcb   :  { %v1741_v16 = vadd.f32 1.0, %v2657_v15 }
0x1dcd   :  { %2658 = vrcp.f32 %v1741_v16 }
0x1dda   :  { %v2659_v17 = vpop.eup %2658 }
0x1ddb   :  { %v1744_v18 = vadd.f32 %v2659_v17, %v2659_v17 }
0x1ddd   :  { %v2204_v48 = vadd.f32 -1.0, %v1744_v18 }
0x1ddf   :  { %v1746_v62 = vsel %vm2961_vm4, %v2204_v48, %v2659_v17 }
0x1de0   :  { %1749 = vrot.lane.b32.xlu1 %v1746_v62, %s2688_s6  ;;  %v1747_v45 = vmul.f32 %v1746_v62, %v1675_v31 }
0x1e52   :  { %v1750_v19 = vpop.permute.xlu1 %1749 }
0x1e53   :  { %v1752_v20 = vmul.f32 %v1750_v19, %v1746_v62 }
0x1e55   :  { %1754 = vrot.lane.b32.xlu0 %v1752_v20, %s2689_s16 }
0x1ec7   :  { %v1755_v32 = vpop.permute.xlu0 %1754 }
0x1ec8   :  { %v1757_v49 = vadd.f32 %v1755_v32, %v1747_v45  ;;  %v1432_v32 = vadd.f32 %v3213_v30, %v3146_v1 }
0x1eca   :  { %2660 = vtanh.f32 %v1757_v49 }
0x1ed7   :  { %v2661_v21 = vpop.eup %2660 }
0x1ed8   :  { %1760 = vrot.lane.b32.xlu1 %v2661_v21, %s2688_s6 }
0x1f4a   :  { %v1761_v22 = vpop.permute.xlu1 %1760 }
0x1f4b   :  { %v3251_v25 = vmul.f32 %v1761_v22, %v1746_v62 }
0x1f4d   :  { %v1766_v26 = vpack.c.bf16 %v3251_v25, %v3251_v25 }
0x1f4f   :  { %1768 = vrot.lane.b32.xlu0 %v1766_v26, %s2689_s16 }
0x1fc1   :  { %v1769_v27 = vpop.permute.xlu0 %1768 }
0x1fc2   :  { %2490 = vmatmul.mubr.msk.bf16.vlgmr.msra.gmra.mxu0 %vm650_vm1, %v1769_v27 }
0x1fc3   :  { %2502 = vmatpush3.bf16.msra.mxu0 %v3113_v35  ;;  %2505 = vmatprep.mubr.msk.bf16.mxu0 %vm2687_vm0, %v2686_v46 }
0x1fc4   :  { %2503 = vmatprep.subr.bf16.mxu0 %v2686_v46 }
0x1fc7   :  { %2504 = vmatpush3.bf16.msra.mxu0 %v3121_v3 }
0x2082   :  { %v1807_v28 = vpop.f32.mrf.mxu0 }
0x2083   :  { %v1813_v29 = vadd.f32 %v1807_v28, %v1424_v41 }
0x2084   :  { %v2491_v34 = vpop.f32.mrf.mxu0 }
0x2085   :  { %v1814_v36 = vadd.f32 %v1813_v29, %v1813_v29 }
0x2086   :  { %v1810_v37 = vpop.f32.mrf.mxu0 }
0x2087   :  { %v1815_v38 = vsel %vm2961_vm4, %v1814_v36, %v1813_v29 }
0x2088   :  { %v2206_v39 = vmul.f32 -1.442695, %v1815_v38  ;;  %v2492_v47 = vpop.f32.mrf.mxu0 }
0x208a   :  { %2662 = vpow2.f32 %v2206_v39 }
0x2097   :  { %v2663_v50 = vpop.eup %2662 }
0x2098   :  { %v1819_v51 = vadd.f32 1.0, %v2663_v50 }
0x209a   :  { %2664 = vrcp.f32 %v1819_v51 }
0x20a7   :  { %v2665_v52 = vpop.eup %2664 }
0x20a8   :  { %v1822_v43 = vadd.f32 %v2665_v52, %v2665_v52 }
0x20aa   :  { %v2207_v54 = vadd.f32 -1.0, %v1822_v43 }
0x20ac   :  { %v1824_v9 = vsel %vm2961_vm4, %v2207_v54, %v2665_v52 }
0x20ad   :  { %1827 = vrot.lane.b32.xlu1 %v1824_v9, %s2688_s6  ;;  %v1825_v59 = vmul.f32 %v1824_v9, %v1757_v49 }
0x211f   :  { %v1828_v56 = vpop.permute.xlu1 %1827 }
0x2120   :  { %v1830_v57 = vmul.f32 %v1828_v56, %v1824_v9 }
0x2122   :  { %1832 = vrot.lane.b32.xlu0 %v1830_v57, %s2689_s16 }
0x2194   :  { %v1833_v6 = vpop.permute.xlu0 %1832 }
0x2195   :  { %v1835_v60 = vadd.f32 %v1833_v6, %v1825_v59  ;;  %v1435_v6 = vadd.f32 %v3217_v23, %v3146_v1 }
0x2197   :  { %2666 = vtanh.f32 %v1835_v60 }
0x21a4   :  { %v2667_v14 = vpop.eup %2666 }
0x21a5   :  { %1838 = vrot.lane.b32.xlu1 %v2667_v14, %s2688_s6 }
0x2217   :  { %v1839_v10 = vpop.permute.xlu1 %1838 }
0x2218   :  { %v3271_v58 = vmul.f32 %v1839_v10, %v1824_v9 }
0x221a   :  { %v1847_v31 = vpack.c.bf16 %v3271_v58, %v3271_v58 }
0x221c   :  { %1849 = vrot.lane.b32.xlu0 %v1847_v31, %s2689_s16 }
0x228e   :  { %v1850_v61 = vpop.permute.xlu0 %1849 }
0x228f   :  { %2498 = vmatmul.mubr.msk.bf16.vlgmr.msra.gmra.mxu1 %vm650_vm1, %v1850_v61 }
0x2290   :  { %2510 = vmatpush3.bf16.msra.mxu1 %v3113_v35  ;;  %2513 = vmatprep.mubr.msk.bf16.mxu1 %vm2687_vm0, %v2686_v46 }
0x2291   :  { %2511 = vmatprep.subr.bf16.mxu1 %v2686_v46 }
0x2294   :  { %2512 = vmatpush3.bf16.msra.mxu1 %v3121_v3 }
0x234f   :  { %v1888_v2 = vpop.f32.mrf.mxu1 }
0x2350   :  { %v1894_v42 = vadd.f32 %v1888_v2, %v1427_v0 }
0x2351   :  { %v2499_v5 = vpop.f32.mrf.mxu1 }
0x2352   :  { %v1895_v7 = vadd.f32 %v1894_v42, %v1894_v42 }
0x2353   :  { %v1891_v4 = vpop.f32.mrf.mxu1 }
0x2354   :  { %v1896_v63 = vsel %vm2961_vm4, %v1895_v7, %v1894_v42 }
0x2355   :  { %v2209_v8 = vmul.f32 -1.442695, %v1896_v63  ;;  %v2500_v35 = vpop.f32.mrf.mxu1 }
0x2357   :  { %2668 = vpow2.f32 %v2209_v8 }
0x2364   :  { %v2669_v11 = vpop.eup %2668 }
0x2365   :  { %v1900_v12 = vadd.f32 1.0, %v2669_v11 }
0x2367   :  { %2670 = vrcp.f32 %v1900_v12 }
0x2374   :  { %v2671_v46 = vpop.eup %2670 }
0x2375   :  { %v1903_v13 = vadd.f32 %v2671_v46, %v2671_v46 }
0x2377   :  { %v2210_v3 = vadd.f32 -1.0, %v1903_v13 }
0x2379   :  { %v1905_v33 = vsel %vm2961_vm4, %v2210_v3, %v2671_v46 }
0x237a   :  { %1908 = vrot.lane.b32.xlu1 %v1905_v33, %s2688_s6  ;;  %v1906_v16 = vmul.f32 %v1905_v33, %v1835_v60 }
0x23ec   :  { %v1909_v44 = vpop.permute.xlu1 %1908 }
0x23ed   :  { %v1911_v15 = vmul.f32 %v1909_v44, %v1905_v33 }
0x23ef   :  { %1913 = vrot.lane.b32.xlu0 %v1911_v15, %s2689_s16 }
0x2461   :  { %v1914_v17 = vpop.permute.xlu0 %1913 }
0x2462   :  { %v1916_v18 = vadd.f32 %v1914_v17, %v1906_v16 }
0x2464   :  { %2672 = vtanh.f32 %v1916_v18 }
0x2471   :  { %v2673_v48 = vpop.eup %2672 }
0x2472   :  { %1919 = vrot.lane.b32.xlu1 %v2673_v48, %s2688_s6 }
0x24e4   :  { %v1920_v62 = vpop.permute.xlu1 %1919 }
0x24e5   :  { %v3291_v19 = vmul.f32 %v1920_v62, %v1905_v33 }
0x24e7   :  { %v1928_v20 = vpack.c.bf16 %v3291_v19, %v3291_v19 }
0x24e9   :  { %1930 = vrot.lane.b32.xlu0 %v1928_v20, %s2689_s16 }
0x255b   :  { %v1931_v45 = vpop.permute.xlu0 %1930 }
0x255c   :  { %2506 = vmatmul.mubr.msk.bf16.vlgmr.msra.gmra.mxu0 %vm650_vm1, %v1931_v45 }
0x261c   :  { %v1969_v49 = vpop.f32.mrf.mxu0 }
0x261d   :  { %v1975_v21 = vadd.f32 %v1969_v49, %v1432_v32 }
0x261e   :  { %v2507_v22 = vpop.f32.mrf.mxu0 }
0x261f   :  { %v1976_v26 = vadd.f32 %v1975_v21, %v1975_v21 }
0x2620   :  { %v1972_v27 = vpop.f32.mrf.mxu0 }
0x2621   :  { %v1977_v41 = vsel %vm2961_vm4, %v1976_v26, %v1975_v21 }
0x2622   :  { %v2212_v28 = vmul.f32 -1.442695, %v1977_v41  ;;  %v2508_v29 = vpop.f32.mrf.mxu0 }
0x2624   :  { %2674 = vpow2.f32 %v2212_v28 }
0x2631   :  { %v2675_v34 = vpop.eup %2674 }
0x2632   :  { %v1981_v36 = vadd.f32 1.0, %v2675_v34 }
0x2634   :  { %2676 = vrcp.f32 %v1981_v36 }
0x2641   :  { %v2677_v37 = vpop.eup %2676 }
0x2642   :  { %v1984_v38 = vadd.f32 %v2677_v37, %v2677_v37 }
0x2644   :  { %v2213_v39 = vadd.f32 -1.0, %v1984_v38 }
0x2646   :  { %v1986_v30 = vsel %vm2961_vm4, %v2213_v39, %v2677_v37 }
0x2647   :  { %1989 = vrot.lane.b32.xlu1 %v1986_v30, %s2688_s6  ;;  %v1987_v51 = vmul.f32 %v1986_v30, %v1916_v18 }
0x26b9   :  { %v1990_v47 = vpop.permute.xlu1 %1989 }
0x26ba   :  { %v1992_v50 = vmul.f32 %v1990_v47, %v1986_v30 }
0x26bc   :  { %1994 = vrot.lane.b32.xlu0 %v1992_v50, %s2689_s16 }
0x272e   :  { %v1995_v52 = vpop.permute.xlu0 %1994 }
0x272f   :  { %v1997_v43 = vadd.f32 %v1995_v52, %v1987_v51 }
0x2731   :  { %2678 = vtanh.f32 %v1997_v43 }
0x273e   :  { %v2679_v54 = vpop.eup %2678 }
0x273f   :  { %2000 = vrot.lane.b32.xlu1 %v2679_v54, %s2688_s6 }
0x27b1   :  { %v2001_v9 = vpop.permute.xlu1 %2000 }
0x27b2   :  { %v2003_v56 = vmul.f32 %v2001_v9, %v1986_v30 }
0x27b4   :  { %v2009_v57 = vpack.c.bf16 %v2003_v56, %v2003_v56 }
0x27b6   :  { %2011 = vrot.lane.b32.xlu0 %v2009_v57, %s2689_s16 }
0x2828   :  { %v2012_v59 = vpop.permute.xlu0 %2011 }
0x2829   :  { %2514 = vmatmul.mubr.msk.bf16.vlgmr.msra.gmra.mxu1 %vm650_vm1, %v2012_v59 }
0x28e9   :  { %v2050_v60 = vpop.f32.mrf.mxu1 }
0x28ea   :  { %v2056_v14 = vadd.f32 %v2050_v60, %v1435_v6 }
0x28eb   :  { %v2515_v10 = vpop.f32.mrf.mxu1 }
0x28ec   :  { %v2057_v31 = vadd.f32 %v2056_v14, %v2056_v14 }
0x28ed   :  { %v2053_v61 = vpop.f32.mrf.mxu1 }
0x28ee   :  { %v2058_v0 = vsel %vm2961_vm4, %v2057_v31, %v2056_v14 }
0x28ef   :  { %v2215_v2 = vmul.f32 -1.442695, %v2058_v0  ;;  %v2516_v42 = vpop.f32.mrf.mxu1 }
0x28f1   :  { %2680 = vpow2.f32 %v2215_v2 }
0x28fe   :  { %v2681_v5 = vpop.eup %2680 }
0x28ff   :  { %v2062_v7 = vadd.f32 1.0, %v2681_v5 }
0x2901   :  { %2682 = vrcp.f32 %v2062_v7 }
0x290e   :  { %v2683_v4 = vpop.eup %2682 }
0x290f   :  { %v2065_v63 = vadd.f32 %v2683_v4, %v2683_v4 }
0x2911   :  { %v2216_v8 = vadd.f32 -1.0, %v2065_v63 }
0x2913   :  { %v2067_v1 = vsel %vm2961_vm4, %v2216_v8, %v2683_v4 }
0x2914   :  { %2070 = vrot.lane.b32.xlu1 %v2067_v1, %s2688_s6 }
0x2918   :  { %1520 = vrot.lane.b32.xlu1 %v3161_v53, %s2689_s16  ;;  %v2068_v53 = vmul.f32 %v2067_v1, %v1997_v43 }
0x291c   :  { %1601 = vrot.lane.b32.xlu1 %v3195_v24, %s2688_s6 }
0x2986   :  { %v2071_v23 = vpop.permute.xlu1 %2070 }
0x2987   :  { %v2073_v35 = vmul.f32 %v2071_v23, %v2067_v1 }
0x2989   :  { %2075 = vrot.lane.b32.xlu0 %v2073_v35, %s2689_s16 }
0x298a   :  { %v1521_v11 = vpop.permute.xlu1 %1520 }
0x298b   :  { %1523 = vst.msk [vmem:[%s3363_s10] sm:$0xff] %vm650_vm1, %v1521_v11 }
0x298d   :  { %1843 = vrot.lane.b32.xlu0 %v3271_v58, %s2689_s16 }
0x298e   :  { %v1602_v55 = vpop.permute.xlu1 %1601 }
0x298f   :  { %1605 = vst.msk [vmem:[%s3363_s10] sm:$0xff] %vm1604_vm6, %v1602_v55 }
0x2991   :  { %1924 = vrot.lane.b32.xlu0 %v3291_v19, %s2688_s6 }
0x2995   :  { %1683 = vrot.lane.b32.xlu0 %v3230_v40, %s2690_s4 }
0x29fb   :  { %v2076_v24 = vpop.permute.xlu0 %2075 }
0x29fc   :  { %v2078_v12 = vadd.f32 %v2076_v24, %v2068_v53 }
0x29fe   :  { %2684 = vtanh.f32 %v2078_v12 }
0x29ff   :  { %v1844_v46 = vpop.permute.xlu0 %1843 }
0x2a00   :  { %1846 = vst.msk [vmem:[%s3363_s10 + $0x8] sm:$0xff] %vm650_vm1, %v1844_v46 }
0x2a03   :  { %v1925_v58 = vpop.permute.xlu0 %1924 }
0x2a04   :  { %1927 = vst.msk [vmem:[%s3363_s10 + $0x8] sm:$0xff] %vm1604_vm6, %v1925_v58 }
0x2a07   :  { %v1684_v13 = vpop.permute.xlu0 %1683 }
0x2a08   :  { %1687 = vst.msk [vmem:[%s3363_s10] sm:$0xff] %vm1686_vm7, %v1684_v13 }
0x2a09   :  { %1765 = vst.msk [vmem:[%s3363_s10] sm:$0xff] %vm1764_vm8, %v3251_v25 }
0x2a0b   :  { %v2685_v40 = vpop.eup %2684 }
0x2a0c   :  { %2081 = vrot.lane.b32.xlu1 %v2685_v40, %s2688_s6 }
0x2a10   :  { %2005 = vrot.lane.b32.xlu1 %v2003_v56, %s2690_s4 }
0x2a7e   :  { %v2082_v3 = vpop.permute.xlu1 %2081 }
0x2a7f   :  { %v2084_v33 = vmul.f32 %v2082_v3, %v2067_v1 }
0x2a82   :  { %v2006_v44 = vpop.permute.xlu1 %2005 }
0x2a83   :  { %2008 = vst.msk [vmem:[%s3363_s10 + $0x8] sm:$0xff] %vm1686_vm7, %v2006_v44 }
0x2a84   :  { %2085 = vst.msk [vmem:[%s3363_s10 + $0x8] sm:$0xff] %vm1764_vm8, %v2084_v33 }

</bundles_post_ra>
